<compile_context>
chip_gen: v7x
topology: tpu7x:2x2x1
jax: 0.10.0
libtpu: 0.0.40
codegen_flags: <defaults>
</compile_context>

<pallas_src>
import numpy as np
import jax
import jax.numpy as jnp
from jax.experimental import pallas as pl
from jax.experimental.pallas import tpu as pltpu  # noqa: F401  (imported per template)

# ----------------------------- configuration ------------------------------ #
B          = 2      # batch
MAX_N      = 8      # graph size (power of two -> shift/and index math in-kernel)
VERT_F_IN  = 4
EDGE_F_IN  = 4
INTERNAL_D = 32     # internal_d_vert (conceptual width)
LAYER_N    = 2      # mp layer count
FINAL_D    = 64     # final_d_out
DIM_OUT    = 4
CHAN_OUT   = 1
INIT_NOISE = 0.01
BN_EPS     = 1e-5

_PD = FINAL_D       # padded compute width: everything is zero-padded to 64 lanes

assert MAX_N > 0 and (MAX_N & (MAX_N - 1)) == 0, "MAX_N must be a power of two"
assert INTERNAL_D <= _PD and FINAL_D <= _PD and DIM_OUT <= _PD


# ------------------------------ fused kernel ------------------------------- #
def _fused_forward_kernel(v_in_ref, e_in_ref, vm_ref, em_ref, inv_ref,
                          p_ref, w_ref, sel_ref, out_ref):
    """Whole MPMLPOutNet forward on VMEM-resident data (all f32, width _PD=64).

    v_in_ref : (B*N, PD)        vertex features, zero-padded to PD
    e_in_ref : (B*N*N, PD)      edge features, zero-padded to PD
    vm_ref   : (B*N, 1)         vertex mask
    em_ref   : (B*N*N, 1)       edge mask (outer product of vertex masks)
    inv_ref  : (2, 1)           [1/count_vert, 1/count_edge] for the masked BNs
    p_ref    : (4+2L+2, PD)     packed rows: vg, vb, eg, eb, bv[0..L-1],
                                be[0..L-1], b1, b2 (each zero/one-padded to PD)
    w_ref    : (2L+2, PD, PD)   packed: Wv[0..L-1], We[0..L-1], W1, W2 (padded)
    sel_ref  : (B*T, B*N*N)     0/1 upper-triangular (k=1) row gather
    out_ref  : (B*T, DIM_OUT)
    """
    f32 = jnp.float32
    N = MAX_N
    NS = N.bit_length() - 1             # log2(N)
    BN_ = B * N
    BNN = B * N * N
    PD = _PD

    vm = vm_ref[...]                    # (B*N, 1)
    em = em_ref[...]                    # (B*N*N, 1)
    inv = inv_ref[...]                  # (2, 1)
    p = p_ref[...]                      # (10, PD)

    # TODO(synk): MaskedBatchNorm1d source is not part of the spec; training-mode
    # masked batch statistics (biased variance, count clamped >= 1) stand in here.
    def masked_bn(x, m, inv_cnt, g, b):
        # one-pass stats: single lane-packed cross-sublane reduction,
        # reciprocal count hoisted to the wrapper.
        xm = x * m
        s = jnp.sum(jnp.concatenate([xm, x * xm], axis=-1),
                    axis=0, keepdims=True)                        # (1, 2*PD)
        mean = s[:, :PD] * inv_cnt
        var = jnp.maximum(s[:, PD:] * inv_cnt - mean * mean, 0.0)
        return (x - mean) * jax.lax.rsqrt(var + BN_EPS) * g + b

    # masked input BN (padded feature columns stay zero), then input masking
    v = masked_bn(v_in_ref[...], vm, inv[0:1, :], p[0:1, :], p[1:2, :]) * vm   # (B*N,   PD)
    e = masked_bn(e_in_ref[...], em, inv[1:2, :], p[2:3, :], p[3:4, :]) * em   # (B*N*N, PD)

    # structural 0/1 operators generated in-kernel from iota (no constant DMAs)
    rs = jax.lax.broadcasted_iota(jnp.int32, (BN_, BNN), 0)
    cs = jax.lax.broadcasted_iota(jnp.int32, (BN_, BNN), 1)
    sumj = jnp.where((cs >> NS) == rs, 1.0, 0.0).astype(f32)      # row (b,i) sums e[b,i,j,:]

    r = jax.lax.broadcasted_iota(jnp.int32, (BNN, BN_), 0)
    c = jax.lax.broadcasted_iota(jnp.int32, (BNN, BN_), 1)
    bij = (jnp.where((r >> NS) == c, 1.0, 0.0)                    # picks v[b,i]
           + jnp.where(((r >> (2 * NS)) == (c >> NS))
                       & ((r & (N - 1)) == (c & (N - 1))),
                       1.0, 0.0)).astype(f32)                     # + picks v[b,j]

    # TODO(synk): self.mp is produced by create_mp via eval(config['name']); the concrete
    # MP class is not part of this module, so a canonical residual edge<->vertex message
    # passing stack (layer_n layers) stands in for it (same placeholder as before).
    for li in range(LAYER_N):
        agg = jnp.dot(sumj, e, preferred_element_type=f32)                      # (B*N, PD)
        v = jnp.maximum(
            jnp.dot(v + agg, w_ref[li], preferred_element_type=f32)
            + p[4 + li:5 + li, :], 0.0) * vm                                    # (B*N, PD)
        v_osum = jnp.dot(bij, v, preferred_element_type=f32)                    # (B*N*N, PD)
        e = jnp.maximum(
            jnp.dot(e + v_osum, w_ref[LAYER_N + li], preferred_element_type=f32)
            + p[4 + LAYER_N + li:5 + LAYER_N + li, :], 0.0) * em                # (B*N*N, PD)

    # upper-triangular gather BEFORE the final MLP: only B*T rows are projected
    e_triu = jnp.dot(sel_ref[...], e, preferred_element_type=f32)               # (B*T, PD)
    h = jnp.maximum(
        jnp.dot(e_triu, w_ref[2 * LAYER_N], preferred_element_type=f32)
        + p[4 + 2 * LAYER_N:5 + 2 * LAYER_N, :], 0.0)                           # (B*T, PD)
    out = (jnp.dot(h, w_ref[2 * LAYER_N + 1], preferred_element_type=f32)
           + p[5 + 2 * LAYER_N:6 + 2 * LAYER_N, :])                             # (B*T, PD)
    out_ref[...] = out[:, :DIM_OUT].astype(out_ref.dtype)                       # (B*T, O)


# ------------------------- static structural helpers ----------------------- #
def _triu_select_matrix(batch_n, max_n):
    """0/1 matrix selecting the flattened upper-triangular (k=1) edge rows."""
    rr, cc = np.triu_indices(max_n, k=1)
    flat = (rr * max_n + cc).astype(np.int64)
    t = flat.shape[0]
    sel = np.zeros((batch_n * t, batch_n * max_n * max_n), np.float32)
    for b in range(batch_n):
        for s, idx in enumerate(flat):
            sel[b * t + s, b * max_n * max_n + int(idx)] = 1.0
    return sel


# ------------------------------ parameter init ----------------------------- #
def init_params(key):
    def lin(k, d_in, d_out):
        # force_lin_init: normal(0, init_noise), bias forced to zero
        w = INIT_NOISE * jax.random.normal(k, (d_in, d_out), jnp.float32)
        b = jnp.zeros((d_out,), jnp.float32)
        return w, b

    keys = jax.random.split(key, 2 * LAYER_N + 2)
    params = {
        "v_bn_g": jnp.ones((VERT_F_IN,), jnp.float32),
        "v_bn_b": jnp.zeros((VERT_F_IN,), jnp.float32),
        "e_bn_g": jnp.ones((EDGE_F_IN,), jnp.float32),
        "e_bn_b": jnp.zeros((EDGE_F_IN,), jnp.float32),
        "mp": [],
    }
    for li in range(LAYER_N):
        wv, bv = lin(keys[2 * li], INTERNAL_D, INTERNAL_D)
        we, be = lin(keys[2 * li + 1], INTERNAL_D, INTERNAL_D)
        params["mp"].append({"Wv": wv, "bv": bv, "We": we, "be": be})
    params["W1"], params["b1"] = lin(keys[-2], INTERNAL_D, FINAL_D)   # final_mlp_out
    params["W2"], params["b2"] = lin(keys[-1], FINAL_D, DIM_OUT)      # final_out
    return params


def prepare_packed_params(params):
    """One-time packing of all parameters (hoisted out of the per-call path)."""
    f = _PD

    def row(x, fill=0.0):
        x = jnp.asarray(x, jnp.float32).reshape(-1)
        return jnp.pad(x, (0, f - x.shape[0]), constant_values=fill)[None, :]

    rows = [row(params["v_bn_g"], 1.0), row(params["v_bn_b"]),
            row(params["e_bn_g"], 1.0), row(params["e_bn_b"])]
    rows += [row(params["mp"][li]["bv"]) for li in range(LAYER_N)]
    rows += [row(params["mp"][li]["be"]) for li in range(LAYER_N)]
    rows += [row(params["b1"]), row(params["b2"])]
    p_pack = jnp.concatenate(rows, axis=0)                              # (10, PD)

    def mat(w):
        w = jnp.asarray(w, jnp.float32)
        return jnp.pad(w, ((0, f - w.shape[0]), (0, f - w.shape[1])))

    w_pack = jnp.stack(
        [mat(params["mp"][li]["Wv"]) for li in range(LAYER_N)]
        + [mat(params["mp"][li]["We"]) for li in range(LAYER_N)]
        + [mat(params["W1"]), mat(params["W2"])])                       # (2L+2, PD, PD)

    sel = jnp.asarray(_triu_select_matrix(B, MAX_N))                    # (B*T, B*N*N)
    return {"p_pack": p_pack, "w_pack": w_pack, "sel": sel}


# --------------------------------- forward --------------------------------- #
def mpmlp_out_forward(packed, v_in, e_in, graph_conn_in, out_mask, vert_mask,
                      possible_edge_prior, possible_val):
    """Matches MPMLPOutNet.forward with default flags (combine_graph_in=False,
    e_bn_pre_mlp=False, mask_val_edges=False, logsoftmax_out=False, pos_out=False).
    Returns (BATCH_N, MAX_N*(MAX_N-1)/2, dim_out, chan_out)."""
    batch_n, max_n, fv = v_in.shape
    fe = e_in.shape[-1]
    bn, bnn = batch_n * max_n, batch_n * max_n * max_n
    n_triu = max_n * (max_n - 1) // 2

    # per-call input prep (trivial): feature-pad to compute width, flatten, masks
    v_p = jnp.pad(v_in, ((0, 0), (0, 0), (0, _PD - fv))).reshape(bn, _PD)
    e_p = jnp.pad(e_in, ((0, 0), (0, 0), (0, 0), (0, _PD - fe))).reshape(bnn, _PD)
    vm = vert_mask.reshape(bn, 1)
    em = (vert_mask[:, :, None] * vert_mask[:, None, :]).reshape(bnn, 1)

    # masked-BN counts hoisted out of the kernel
    inv_cnt = jnp.stack([1.0 / jnp.maximum(jnp.sum(vm), 1.0),
                         1.0 / jnp.maximum(jnp.sum(em), 1.0)]
                        ).reshape(2, 1).astype(jnp.float32)

    out = pl.pallas_call(
        _fused_forward_kernel,
        out_shape=jax.ShapeDtypeStruct((batch_n * n_triu, DIM_OUT), jnp.float32),
        cost_estimate=pl.CostEstimate(flops=5_250_000, transcendentals=128,
                                      bytes_accessed=170_000),
    )(v_p, e_p, vm, em, inv_cnt, packed["p_pack"], packed["w_pack"], packed["sel"])

    # (B, N*(N-1)/2, dim_out, chan_out); logsoftmax_out / pos_out are off
    return out.reshape(batch_n, n_triu, DIM_OUT)[..., None]


# ----------------------------------- main ----------------------------------- #
if __name__ == "__main__":
    key = jax.random.PRNGKey(0)
    kp, kv, ke, kg, kpe, kpv = jax.random.split(key, 6)

    params = init_params(kp)
    packed = prepare_packed_params(params)       # one-time packing (not per call)

    v_in = jax.random.normal(kv, (B, MAX_N, VERT_F_IN), jnp.float32)
    e_in = jax.random.normal(ke, (B, MAX_N, MAX_N, EDGE_F_IN), jnp.float32)
    graph_conn_in = jax.random.normal(kg, (B, MAX_N, MAX_N, 4), jnp.float32)   # unused (combine_graph_in=False)
    vert_mask = jnp.stack([
        jnp.concatenate([jnp.ones((6,), jnp.float32), jnp.zeros((2,), jnp.float32)]),
        jnp.ones((MAX_N,), jnp.float32),
    ])                                                                         # (B, MAX_N)
    n_triu = MAX_N * (MAX_N - 1) // 2
    out_mask = jnp.ones((B, n_triu), jnp.float32)                              # unused by forward
    possible_edge_prior = jax.random.uniform(kpe, (B, MAX_N, MAX_N), jnp.float32)        # unused
    possible_val = jax.random.uniform(kpv, (B, MAX_N, MAX_N, DIM_OUT), jnp.float32)      # unused (mask_val_edges=False)

    fwd = jax.jit(mpmlp_out_forward)
    out = fwd(packed, v_in, e_in, graph_conn_in, out_mask, vert_mask,
              possible_edge_prior, possible_val)
    out = jax.block_until_ready(out)

    assert out.shape == (B, n_triu, DIM_OUT, CHAN_OUT), out.shape
    assert bool(jnp.all(jnp.isfinite(out)))
    print("KERNEL_OK")
</pallas_src>

<mosaic_0001>
module attributes {stable_mosaic.version = 11 : i64} {
  func.func @_fused_forward_kernel(%arg0: memref<16x64xf32, #tpu.memory_space<vmem>>, %arg1: memref<128x64xf32, #tpu.memory_space<vmem>>, %arg2: memref<16x1xf32, #tpu.memory_space<vmem>>, %arg3: memref<128x1xf32, #tpu.memory_space<vmem>>, %arg4: memref<2x1xf32, #tpu.memory_space<vmem>>, %arg5: memref<10x64xf32, #tpu.memory_space<vmem>>, %arg6: memref<6x64x64xf32, #tpu.memory_space<vmem>>, %arg7: memref<56x128xf32, #tpu.memory_space<vmem>>, %arg8: memref<56x4xf32, #tpu.memory_space<vmem>>) attributes {dimension_semantics = [], scalar_prefetch = 0 : i64, scratch_operands = 0 : i64, tpu.core_type = #tpu.core_type<tc>} {
    %c0 = arith.constant 0 : index
    %c0_0 = arith.constant 0 : index
    %0 = vector.load %arg2[%c0, %c0_0] : memref<16x1xf32, #tpu.memory_space<vmem>>, vector<16x1xf32>
    %c0_1 = arith.constant 0 : index
    %c0_2 = arith.constant 0 : index
    %1 = vector.load %arg3[%c0_1, %c0_2] : memref<128x1xf32, #tpu.memory_space<vmem>>, vector<128x1xf32>
    %c0_3 = arith.constant 0 : index
    %c0_4 = arith.constant 0 : index
    %2 = vector.load %arg4[%c0_3, %c0_4] : memref<2x1xf32, #tpu.memory_space<vmem>>, vector<2x1xf32>
    %c0_5 = arith.constant 0 : index
    %c0_6 = arith.constant 0 : index
    %3 = vector.load %arg5[%c0_5, %c0_6] : memref<10x64xf32, #tpu.memory_space<vmem>>, vector<10x64xf32>
    %c0_7 = arith.constant 0 : index
    %c0_8 = arith.constant 0 : index
    %4 = vector.load %arg0[%c0_7, %c0_8] : memref<16x64xf32, #tpu.memory_space<vmem>>, vector<16x64xf32>
    %5 = vector.extract_strided_slice %2 {offsets = [0, 0], sizes = [1, 1], strides = [1, 1]} : vector<2x1xf32> to vector<1x1xf32>
    %6 = vector.extract_strided_slice %3 {offsets = [0, 0], sizes = [1, 64], strides = [1, 1]} : vector<10x64xf32> to vector<1x64xf32>
    %7 = vector.extract_strided_slice %3 {offsets = [1, 0], sizes = [1, 64], strides = [1, 1]} : vector<10x64xf32> to vector<1x64xf32>
    %8 = vector.broadcast %0 : vector<16x1xf32> to vector<16x64xf32>
    %9 = arith.mulf %4, %8 : vector<16x64xf32>
    %10 = arith.mulf %4, %9 : vector<16x64xf32>
    %11 = tpu.concatenate %9, %10 in 1 : vector<16x64xf32>, vector<16x64xf32> -> vector<16x128xf32>
    %cst = arith.constant dense<0.000000e+00> : vector<128xf32>
    %12 = vector.multi_reduction <add>, %11, %cst [0] : vector<16x128xf32> to vector<128xf32>
    %13 = vector.shape_cast %12 : vector<128xf32> to vector<1x128xf32>
    %14 = vector.extract_strided_slice %13 {offsets = [0, 0], sizes = [1, 64], strides = [1, 1]} : vector<1x128xf32> to vector<1x64xf32>
    %15 = vector.broadcast %5 : vector<1x1xf32> to vector<1x64xf32>
    %16 = arith.mulf %14, %15 : vector<1x64xf32>
    %17 = vector.extract_strided_slice %13 {offsets = [0, 64], sizes = [1, 64], strides = [1, 1]} : vector<1x128xf32> to vector<1x64xf32>
    %18 = vector.broadcast %5 : vector<1x1xf32> to vector<1x64xf32>
    %19 = arith.mulf %17, %18 : vector<1x64xf32>
    %20 = arith.mulf %16, %16 : vector<1x64xf32>
    %21 = arith.subf %19, %20 : vector<1x64xf32>
    %cst_9 = arith.constant 0.000000e+00 : f32
    %22 = vector.broadcast %cst_9 : f32 to vector<1x64xf32>
    %23 = arith.maximumf %21, %22 : vector<1x64xf32>
    %24 = vector.broadcast %16 : vector<1x64xf32> to vector<16x64xf32>
    %25 = arith.subf %4, %24 : vector<16x64xf32>
    %cst_10 = arith.constant 9.99999974E-6 : f32
    %26 = vector.broadcast %cst_10 : f32 to vector<1x64xf32>
    %27 = arith.addf %23, %26 : vector<1x64xf32>
    %28 = math.rsqrt %27 : vector<1x64xf32>
    %29 = vector.broadcast %28 : vector<1x64xf32> to vector<16x64xf32>
    %30 = arith.mulf %25, %29 : vector<16x64xf32>
    %31 = vector.broadcast %6 : vector<1x64xf32> to vector<16x64xf32>
    %32 = arith.mulf %30, %31 : vector<16x64xf32>
    %33 = vector.broadcast %7 : vector<1x64xf32> to vector<16x64xf32>
    %34 = arith.addf %32, %33 : vector<16x64xf32>
    %35 = vector.broadcast %0 : vector<16x1xf32> to vector<16x64xf32>
    %36 = arith.mulf %34, %35 : vector<16x64xf32>
    %c0_11 = arith.constant 0 : index
    %c0_12 = arith.constant 0 : index
    %37 = vector.load %arg1[%c0_11, %c0_12] : memref<128x64xf32, #tpu.memory_space<vmem>>, vector<128x64xf32>
    %38 = vector.extract_strided_slice %2 {offsets = [1, 0], sizes = [1, 1], strides = [1, 1]} : vector<2x1xf32> to vector<1x1xf32>
    %39 = vector.extract_strided_slice %3 {offsets = [2, 0], sizes = [1, 64], strides = [1, 1]} : vector<10x64xf32> to vector<1x64xf32>
    %40 = vector.extract_strided_slice %3 {offsets = [3, 0], sizes = [1, 64], strides = [1, 1]} : vector<10x64xf32> to vector<1x64xf32>
    %41 = vector.broadcast %1 : vector<128x1xf32> to vector<128x64xf32>
    %42 = arith.mulf %37, %41 : vector<128x64xf32>
    %43 = arith.mulf %37, %42 : vector<128x64xf32>
    %44 = tpu.concatenate %42, %43 in 1 : vector<128x64xf32>, vector<128x64xf32> -> vector<128x128xf32>
    %cst_13 = arith.constant dense<0.000000e+00> : vector<128xf32>
    %45 = vector.multi_reduction <add>, %44, %cst_13 [0] : vector<128x128xf32> to vector<128xf32>
    %46 = vector.shape_cast %45 : vector<128xf32> to vector<1x128xf32>
    %47 = vector.extract_strided_slice %46 {offsets = [0, 0], sizes = [1, 64], strides = [1, 1]} : vector<1x128xf32> to vector<1x64xf32>
    %48 = vector.broadcast %38 : vector<1x1xf32> to vector<1x64xf32>
    %49 = arith.mulf %47, %48 : vector<1x64xf32>
    %50 = vector.extract_strided_slice %46 {offsets = [0, 64], sizes = [1, 64], strides = [1, 1]} : vector<1x128xf32> to vector<1x64xf32>
    %51 = vector.broadcast %38 : vector<1x1xf32> to vector<1x64xf32>
    %52 = arith.mulf %50, %51 : vector<1x64xf32>
    %53 = arith.mulf %49, %49 : vector<1x64xf32>
    %54 = arith.subf %52, %53 : vector<1x64xf32>
    %cst_14 = arith.constant 0.000000e+00 : f32
    %55 = vector.broadcast %cst_14 : f32 to vector<1x64xf32>
    %56 = arith.maximumf %54, %55 : vector<1x64xf32>
    %57 = vector.broadcast %49 : vector<1x64xf32> to vector<128x64xf32>
    %58 = arith.subf %37, %57 : vector<128x64xf32>
    %cst_15 = arith.constant 9.99999974E-6 : f32
    %59 = vector.broadcast %cst_15 : f32 to vector<1x64xf32>
    %60 = arith.addf %56, %59 : vector<1x64xf32>
    %61 = math.rsqrt %60 : vector<1x64xf32>
    %62 = vector.broadcast %61 : vector<1x64xf32> to vector<128x64xf32>
    %63 = arith.mulf %58, %62 : vector<128x64xf32>
    %64 = vector.broadcast %39 : vector<1x64xf32> to vector<128x64xf32>
    %65 = arith.mulf %63, %64 : vector<128x64xf32>
    %66 = vector.broadcast %40 : vector<1x64xf32> to vector<128x64xf32>
    %67 = arith.addf %65, %66 : vector<128x64xf32>
    %68 = vector.broadcast %1 : vector<128x1xf32> to vector<128x64xf32>
    %69 = arith.mulf %67, %68 : vector<128x64xf32>
    %70 = tpu.iota {dimensions = array<i32: 0>} : vector<16x128xi32>
    %71 = tpu.iota {dimensions = array<i32: 1>} : vector<16x128xi32>
    %c3_i32 = arith.constant 3 : i32
    %72 = vector.broadcast %c3_i32 : i32 to vector<16x128xi32>
    %73 = arith.shrsi %71, %72 : vector<16x128xi32>
    %74 = arith.cmpi eq, %73, %70 : vector<16x128xi32>
    %cst_16 = arith.constant 1.000000e+00 : f32
    %cst_17 = arith.constant 0.000000e+00 : f32
    %75 = vector.broadcast %cst_16 : f32 to vector<16x128xf32>
    %76 = vector.broadcast %cst_17 : f32 to vector<16x128xf32>
    %77 = arith.select %74, %75, %76 : vector<16x128xi1>, vector<16x128xf32>
    %78 = tpu.iota {dimensions = array<i32: 0>} : vector<128x16xi32>
    %79 = tpu.iota {dimensions = array<i32: 1>} : vector<128x16xi32>
    %c3_i32_18 = arith.constant 3 : i32
    %80 = vector.broadcast %c3_i32_18 : i32 to vector<128x16xi32>
    %81 = arith.shrsi %78, %80 : vector<128x16xi32>
    %82 = arith.cmpi eq, %81, %79 : vector<128x16xi32>
    %cst_19 = arith.constant 1.000000e+00 : f32
    %cst_20 = arith.constant 0.000000e+00 : f32
    %83 = vector.broadcast %cst_19 : f32 to vector<128x16xf32>
    %84 = vector.broadcast %cst_20 : f32 to vector<128x16xf32>
    %85 = arith.select %82, %83, %84 : vector<128x16xi1>, vector<128x16xf32>
    %c6_i32 = arith.constant 6 : i32
    %86 = vector.broadcast %c6_i32 : i32 to vector<128x16xi32>
    %87 = arith.shrsi %78, %86 : vector<128x16xi32>
    %c3_i32_21 = arith.constant 3 : i32
    %88 = vector.broadcast %c3_i32_21 : i32 to vector<128x16xi32>
    %89 = arith.shrsi %79, %88 : vector<128x16xi32>
    %90 = arith.cmpi eq, %87, %89 : vector<128x16xi32>
    %c7_i32 = arith.constant 7 : i32
    %91 = vector.broadcast %c7_i32 : i32 to vector<128x16xi32>
    %92 = arith.andi %78, %91 : vector<128x16xi32>
    %c7_i32_22 = arith.constant 7 : i32
    %93 = vector.broadcast %c7_i32_22 : i32 to vector<128x16xi32>
    %94 = arith.andi %79, %93 : vector<128x16xi32>
    %95 = arith.cmpi eq, %92, %94 : vector<128x16xi32>
    %96 = arith.andi %90, %95 : vector<128x16xi1>
    %cst_23 = arith.constant 1.000000e+00 : f32
    %cst_24 = arith.constant 0.000000e+00 : f32
    %97 = vector.broadcast %cst_23 : f32 to vector<128x16xf32>
    %98 = vector.broadcast %cst_24 : f32 to vector<128x16xf32>
    %99 = arith.select %96, %97, %98 : vector<128x16xi1>, vector<128x16xf32>
    %100 = arith.addf %85, %99 : vector<128x16xf32>
    %cst_25 = arith.constant dense<0.000000e+00> : vector<16x64xf32>
    %101 = tpu.matmul %77, %69, %cst_25 {dimension_numbers = #tpu.dot_dimension_numbers<[1], [0], [0], [1], [0, 0, 1, 1], [], []>} : vector<16x128xf32>, vector<128x64xf32>, vector<16x64xf32> -> vector<16x64xf32>
    %102 = arith.addf %36, %101 : vector<16x64xf32>
    %c0_26 = arith.constant 0 : index
    %c0_27 = arith.constant 0 : index
    %c0_28 = arith.constant 0 : index
    %103 = vector.load %arg6[%c0_26, %c0_27, %c0_28] : memref<6x64x64xf32, #tpu.memory_space<vmem>>, vector<1x64x64xf32>
    %104 = vector.shape_cast %103 : vector<1x64x64xf32> to vector<64x64xf32>
    %cst_29 = arith.constant dense<0.000000e+00> : vector<16x64xf32>
    %105 = tpu.matmul %102, %104, %cst_29 {dimension_numbers = #tpu.dot_dimension_numbers<[1], [0], [0], [1], [0, 0, 1, 1], [], []>} : vector<16x64xf32>, vector<64x64xf32>, vector<16x64xf32> -> vector<16x64xf32>
    %106 = vector.extract_strided_slice %3 {offsets = [4, 0], sizes = [1, 64], strides = [1, 1]} : vector<10x64xf32> to vector<1x64xf32>
    %107 = vector.broadcast %106 : vector<1x64xf32> to vector<16x64xf32>
    %108 = arith.addf %105, %107 : vector<16x64xf32>
    %cst_30 = arith.constant 0.000000e+00 : f32
    %109 = vector.broadcast %cst_30 : f32 to vector<16x64xf32>
    %110 = arith.maximumf %108, %109 : vector<16x64xf32>
    %111 = vector.broadcast %0 : vector<16x1xf32> to vector<16x64xf32>
    %112 = arith.mulf %110, %111 : vector<16x64xf32>
    %cst_31 = arith.constant dense<0.000000e+00> : vector<128x64xf32>
    %113 = tpu.matmul %100, %112, %cst_31 {dimension_numbers = #tpu.dot_dimension_numbers<[1], [0], [0], [1], [0, 0, 1, 1], [], []>} : vector<128x16xf32>, vector<16x64xf32>, vector<128x64xf32> -> vector<128x64xf32>
    %114 = arith.addf %69, %113 : vector<128x64xf32>
    %c2 = arith.constant 2 : index
    %c0_32 = arith.constant 0 : index
    %c0_33 = arith.constant 0 : index
    %115 = vector.load %arg6[%c2, %c0_32, %c0_33] : memref<6x64x64xf32, #tpu.memory_space<vmem>>, vector<1x64x64xf32>
    %116 = vector.shape_cast %115 : vector<1x64x64xf32> to vector<64x64xf32>
    %cst_34 = arith.constant dense<0.000000e+00> : vector<128x64xf32>
    %117 = tpu.matmul %114, %116, %cst_34 {dimension_numbers = #tpu.dot_dimension_numbers<[1], [0], [0], [1], [0, 0, 1, 1], [], []>} : vector<128x64xf32>, vector<64x64xf32>, vector<128x64xf32> -> vector<128x64xf32>
    %118 = vector.extract_strided_slice %3 {offsets = [6, 0], sizes = [1, 64], strides = [1, 1]} : vector<10x64xf32> to vector<1x64xf32>
    %119 = vector.broadcast %118 : vector<1x64xf32> to vector<128x64xf32>
    %120 = arith.addf %117, %119 : vector<128x64xf32>
    %cst_35 = arith.constant 0.000000e+00 : f32
    %121 = vector.broadcast %cst_35 : f32 to vector<128x64xf32>
    %122 = arith.maximumf %120, %121 : vector<128x64xf32>
    %123 = vector.broadcast %1 : vector<128x1xf32> to vector<128x64xf32>
    %124 = arith.mulf %122, %123 : vector<128x64xf32>
    %cst_36 = arith.constant dense<0.000000e+00> : vector<16x64xf32>
    %125 = tpu.matmul %77, %124, %cst_36 {dimension_numbers = #tpu.dot_dimension_numbers<[1], [0], [0], [1], [0, 0, 1, 1], [], []>} : vector<16x128xf32>, vector<128x64xf32>, vector<16x64xf32> -> vector<16x64xf32>
    %126 = arith.addf %112, %125 : vector<16x64xf32>
    %c1 = arith.constant 1 : index
    %c0_37 = arith.constant 0 : index
    %c0_38 = arith.constant 0 : index
    %127 = vector.load %arg6[%c1, %c0_37, %c0_38] : memref<6x64x64xf32, #tpu.memory_space<vmem>>, vector<1x64x64xf32>
    %128 = vector.shape_cast %127 : vector<1x64x64xf32> to vector<64x64xf32>
    %cst_39 = arith.constant dense<0.000000e+00> : vector<16x64xf32>
    %129 = tpu.matmul %126, %128, %cst_39 {dimension_numbers = #tpu.dot_dimension_numbers<[1], [0], [0], [1], [0, 0, 1, 1], [], []>} : vector<16x64xf32>, vector<64x64xf32>, vector<16x64xf32> -> vector<16x64xf32>
    %130 = vector.extract_strided_slice %3 {offsets = [5, 0], sizes = [1, 64], strides = [1, 1]} : vector<10x64xf32> to vector<1x64xf32>
    %131 = vector.broadcast %130 : vector<1x64xf32> to vector<16x64xf32>
    %132 = arith.addf %129, %131 : vector<16x64xf32>
    %cst_40 = arith.constant 0.000000e+00 : f32
    %133 = vector.broadcast %cst_40 : f32 to vector<16x64xf32>
    %134 = arith.maximumf %132, %133 : vector<16x64xf32>
    %135 = vector.broadcast %0 : vector<16x1xf32> to vector<16x64xf32>
    %136 = arith.mulf %134, %135 : vector<16x64xf32>
    %cst_41 = arith.constant dense<0.000000e+00> : vector<128x64xf32>
    %137 = tpu.matmul %100, %136, %cst_41 {dimension_numbers = #tpu.dot_dimension_numbers<[1], [0], [0], [1], [0, 0, 1, 1], [], []>} : vector<128x16xf32>, vector<16x64xf32>, vector<128x64xf32> -> vector<128x64xf32>
    %138 = arith.addf %124, %137 : vector<128x64xf32>
    %c3 = arith.constant 3 : index
    %c0_42 = arith.constant 0 : index
    %c0_43 = arith.constant 0 : index
    %139 = vector.load %arg6[%c3, %c0_42, %c0_43] : memref<6x64x64xf32, #tpu.memory_space<vmem>>, vector<1x64x64xf32>
    %140 = vector.shape_cast %139 : vector<1x64x64xf32> to vector<64x64xf32>
    %cst_44 = arith.constant dense<0.000000e+00> : vector<128x64xf32>
    %141 = tpu.matmul %138, %140, %cst_44 {dimension_numbers = #tpu.dot_dimension_numbers<[1], [0], [0], [1], [0, 0, 1, 1], [], []>} : vector<128x64xf32>, vector<64x64xf32>, vector<128x64xf32> -> vector<128x64xf32>
    %142 = vector.extract_strided_slice %3 {offsets = [7, 0], sizes = [1, 64], strides = [1, 1]} : vector<10x64xf32> to vector<1x64xf32>
    %143 = vector.broadcast %142 : vector<1x64xf32> to vector<128x64xf32>
    %144 = arith.addf %141, %143 : vector<128x64xf32>
    %cst_45 = arith.constant 0.000000e+00 : f32
    %145 = vector.broadcast %cst_45 : f32 to vector<128x64xf32>
    %146 = arith.maximumf %144, %145 : vector<128x64xf32>
    %147 = vector.broadcast %1 : vector<128x1xf32> to vector<128x64xf32>
    %148 = arith.mulf %146, %147 : vector<128x64xf32>
    %c0_46 = arith.constant 0 : index
    %c0_47 = arith.constant 0 : index
    %149 = vector.load %arg7[%c0_46, %c0_47] : memref<56x128xf32, #tpu.memory_space<vmem>>, vector<56x128xf32>
    %cst_48 = arith.constant dense<0.000000e+00> : vector<56x64xf32>
    %150 = tpu.matmul %149, %148, %cst_48 {dimension_numbers = #tpu.dot_dimension_numbers<[1], [0], [0], [1], [0, 0, 1, 1], [], []>} : vector<56x128xf32>, vector<128x64xf32>, vector<56x64xf32> -> vector<56x64xf32>
    %c4 = arith.constant 4 : index
    %c0_49 = arith.constant 0 : index
    %c0_50 = arith.constant 0 : index
    %151 = vector.load %arg6[%c4, %c0_49, %c0_50] : memref<6x64x64xf32, #tpu.memory_space<vmem>>, vector<1x64x64xf32>
    %152 = vector.shape_cast %151 : vector<1x64x64xf32> to vector<64x64xf32>
    %cst_51 = arith.constant dense<0.000000e+00> : vector<56x64xf32>
    %153 = tpu.matmul %150, %152, %cst_51 {dimension_numbers = #tpu.dot_dimension_numbers<[1], [0], [0], [1], [0, 0, 1, 1], [], []>} : vector<56x64xf32>, vector<64x64xf32>, vector<56x64xf32> -> vector<56x64xf32>
    %154 = vector.extract_strided_slice %3 {offsets = [8, 0], sizes = [1, 64], strides = [1, 1]} : vector<10x64xf32> to vector<1x64xf32>
    %155 = vector.broadcast %154 : vector<1x64xf32> to vector<56x64xf32>
    %156 = arith.addf %153, %155 : vector<56x64xf32>
    %cst_52 = arith.constant 0.000000e+00 : f32
    %157 = vector.broadcast %cst_52 : f32 to vector<56x64xf32>
    %158 = arith.maximumf %156, %157 : vector<56x64xf32>
    %c5 = arith.constant 5 : index
    %c0_53 = arith.constant 0 : index
    %c0_54 = arith.constant 0 : index
    %159 = vector.load %arg6[%c5, %c0_53, %c0_54] : memref<6x64x64xf32, #tpu.memory_space<vmem>>, vector<1x64x64xf32>
    %160 = vector.shape_cast %159 : vector<1x64x64xf32> to vector<64x64xf32>
    %cst_55 = arith.constant dense<0.000000e+00> : vector<56x64xf32>
    %161 = tpu.matmul %158, %160, %cst_55 {dimension_numbers = #tpu.dot_dimension_numbers<[1], [0], [0], [1], [0, 0, 1, 1], [], []>} : vector<56x64xf32>, vector<64x64xf32>, vector<56x64xf32> -> vector<56x64xf32>
    %162 = vector.extract_strided_slice %3 {offsets = [9, 0], sizes = [1, 64], strides = [1, 1]} : vector<10x64xf32> to vector<1x64xf32>
    %163 = vector.broadcast %162 : vector<1x64xf32> to vector<56x64xf32>
    %164 = arith.addf %161, %163 : vector<56x64xf32>
    %165 = vector.extract_strided_slice %164 {offsets = [0, 0], sizes = [56, 4], strides = [1, 1]} : vector<56x64xf32> to vector<56x4xf32>
    %c0_56 = arith.constant 0 : index
    %c0_57 = arith.constant 0 : index
    %166 = vector.load %arg8[%c0_56, %c0_57] : memref<56x4xf32, #tpu.memory_space<vmem>>, vector<56x4xf32>
    tpu.vector_store %arg8[%c0_56, %c0_57], %165 {strides = array<i32>} : memref<56x4xf32, #tpu.memory_space<vmem>>, vector<56x4xf32>,
    return
  }
}

</mosaic_0001>

<bundles_post_ra>
// kernel: mpmlp_out_forward.1
= control target key start
LH: loop header
LB: loop body
LE: loop exit
PB: predicated region body
PF: predicated region fallthrough
CT: control target
= control target key end

     0   :  { %v3138_v0 = vmov 0   ;;  %s3139_s22 = smov 64   ;;  %vm4682_vm0 = vcmask 523264   ;;  %vm827_vm7 = vcmask 130048   ;;  %s4655_s3 = inlined_call_operand.vmem [shape: f32[128,1], index: 3, kind: input, shape index: {}]   ;;  %s4656_s1 = inlined_call_operand.vmem [shape: f32[128,64], index: 1, kind: input, shape index: {}]   ;;  %s4657_s4 = inlined_call_operand.vmem [shape: f32[2,1], index: 4, kind: input, shape index: {}]   ;;  %s4658_s2 = inlined_call_operand.vmem [shape: f32[16,1], index: 2, kind: input, shape index: {}]   ;;  %s4659_s0 = inlined_call_operand.vmem [shape: f32[16,64], index: 0, kind: input, shape index: {}]   ;;  %s4660_s5 = inlined_call_operand.vmem [shape: f32[10,64], index: 5, kind: input, shape index: {}]   ;;  %s4661_s6 = inlined_call_operand.vmem [shape: f32[6,64,64], index: 6, kind: input, shape index: {}]   ;;  %s4662_s7 = inlined_call_operand.vmem [shape: f32[56,128], index: 7, kind: input, shape index: {}]   ;;  %s4663_s8 = inlined_call_operand.vmem [shape: f32[56,4], index: 8, kind: output, shape index: {}]  }
   0x1   :  { %3132 = vset.pattern.permute.xlu1 %v3138_v0  ;;  %3131 = vset.pattern.permute.xlu0 %v3138_v0  ;;  %v33_v1 = vld [vmem:[%s4655_s3 + $0x10] sm:$0xff]  ;;  %v31_v2 = vld [vmem:[%s4655_s3] sm:$0xff]  ;;  %v34_v3 = vld [vmem:[%s4655_s3 + $0x18] sm:$0xff] }
   0x2   :  { %157 = vperm.xlu1 %3132, %v33_v1   ;;  %147 = vperm.xlu0 %3131, %v31_v2   ;;  %v32_v4 = vld [vmem:[%s4655_s3 + $0x8] sm:$0xff]  ;;  %v35_v6 = vld [vmem:[%s4655_s3 + $0x20] sm:$0xff]  ;;  %v38_v7 = vld [vmem:[%s4655_s3 + $0x38] sm:$0xff] }
   0x3   :  { %v36_v5 = vld [vmem:[%s4655_s3 + $0x28] sm:$0xff]  ;;  %v37_v8 = vld [vmem:[%s4655_s3 + $0x30] sm:$0xff]  ;;  %v39_v10 = vld [vmem:[%s4655_s3 + $0x40] sm:$0xff] }
   0x4   :  { %v40_v9 = vld [vmem:[%s4655_s3 + $0x48] sm:$0xff]  ;;  %v42_v11 = vld [vmem:[%s4655_s3 + $0x58] sm:$0xff]  ;;  %v41_v12 = vld [vmem:[%s4655_s3 + $0x50] sm:$0xff] }
   0x5   :  { %v44_v13 = vld [vmem:[%s4655_s3 + $0x68] sm:$0xff]  ;;  %v43_v14 = vld [vmem:[%s4655_s3 + $0x60] sm:$0xff]  ;;  %v46_v15 = vld [vmem:[%s4655_s3 + $0x78] sm:$0xff] }
   0x6   :  { %162 = vperm.xlu1 %3132, %v34_v3   ;;  %152 = vperm.xlu0 %3131, %v32_v4   ;;  %v45_v16 = vld [vmem:[%s4655_s3 + $0x70] sm:$0xff]  ;;  %v3245_v18 = vld [vmem:[%s4656_s1] sm:$0xff]  ;;  %v3262_v23 = vld [vmem:[%s4656_s1 + $0x8] sm:$0xff] }
   0x7   :  { %v3240_v17 = vld [vmem:[%s4656_s1 + $0x10] sm:$0xff]  ;;  %v3271_v26 = vld [vmem:[%s4656_s1 + $0x18] sm:$0xff]  ;;  %v3285_v30 = vld [vmem:[%s4656_s1 + $0x20] sm:$0xff] }
   0x8   :  { %v3298_v34 = vld [vmem:[%s4656_s1 + $0x28] sm:$0xff]  ;;  %v3311_v37 = vld [vmem:[%s4656_s1 + $0x30] sm:$0xff]  ;;  %v3326_v42 = vld [vmem:[%s4656_s1 + $0x38] sm:$0xff] }
   0x9   :  { %v3339_v45 = vld [vmem:[%s4656_s1 + $0x40] sm:$0xff]  ;;  %v3354_v50 = vld [vmem:[%s4656_s1 + $0x48] sm:$0xff]  ;;  %v3367_v53 = vld [vmem:[%s4656_s1 + $0x50] sm:$0xff] }
   0xa   :  { %172 = vperm.xlu1 %3132, %v36_v5   ;;  %167 = vperm.xlu0 %3131, %v35_v6   ;;  %v3382_v58 = vld [vmem:[%s4656_s1 + $0x58] sm:$0xff]  ;;  %v3395_v61 = vld [vmem:[%s4656_s1 + $0x60] sm:$0xff]  ;;  %v3410_v2 = vld [vmem:[%s4656_s1 + $0x68] sm:$0xff] }
   0xb   :  { %v3421_v5 = vld [vmem:[%s4656_s1 + $0x70] sm:$0xff] }
   0xe   :  { %182 = vperm.xlu1 %3132, %v38_v7   ;;  %177 = vperm.xlu0 %3131, %v37_v8  }
  0x12   :  { %192 = vperm.xlu1 %3132, %v40_v9   ;;  %187 = vperm.xlu0 %3131, %v39_v10   ;;  %v3433_v10 = vld [vmem:[%s4656_s1 + $0x78] sm:$0xff] }
  0x16   :  { %202 = vperm.xlu1 %3132, %v42_v11   ;;  %197 = vperm.xlu0 %3131, %v41_v12  }
  0x1a   :  { %212 = vperm.xlu1 %3132, %v44_v13   ;;  %207 = vperm.xlu0 %3131, %v43_v14  }
  0x1e   :  { %222 = vperm.xlu1 %3132, %v46_v15   ;;  %217 = vperm.xlu0 %3131, %v45_v16   ;;  %v47_v16 = vld [vmem:[%s4657_s4] sm:$0x3] }
  0x81   :  { %v3247_v19 = vpop.permute.xlu1 %157  ;;  %v3249_v20 = vpop.permute.xlu0 %147 }
  0x82   :  { %v3253_v21 = vmul.f32 %v3247_v19, %v3240_v17  ;;  %v3257_v22 = vmul.f32 %v3249_v20, %v3245_v18 }
  0x84   :  { %v241_v24 = vmul.f32 %v3257_v22, %v3245_v18  ;;  %v243_v29 = vmul.f32 %v3253_v21, %v3240_v17 }
  0x85   :  { %v3266_v25 = vpop.permute.xlu1 %162  ;;  %v3273_v27 = vpop.permute.xlu0 %152 }
  0x86   :  { %v3277_v28 = vmul.f32 %v3273_v27, %v3262_v23  ;;  %273 = vrot.lane.b32.xlu0 %v241_v24, %s3139_s22  ;;  %v3289_v31 = vmul.f32 %v3266_v25, %v3271_v26 }
  0x88   :  { %v242_v32 = vmul.f32 %v3277_v28, %v3262_v23  ;;  %v244_v39 = vmul.f32 %v3289_v31, %v3271_v26 }
  0x89   :  { %v3293_v33 = vpop.permute.xlu1 %172  ;;  %v3300_v35 = vpop.permute.xlu0 %167 }
  0x8a   :  { %v3304_v36 = vmul.f32 %v3300_v35, %v3285_v30  ;;  %275 = vrot.lane.b32.xlu1 %v242_v32, %s3139_s22  ;;  %277 = vrot.lane.b32.xlu0 %v243_v29, %s3139_s22  ;;  %v3315_v38 = vmul.f32 %v3293_v33, %v3298_v34 }
  0x8c   :  { %v245_v40 = vmul.f32 %v3304_v36, %v3285_v30  ;;  %v246_v47 = vmul.f32 %v3315_v38, %v3298_v34 }
  0x8d   :  { %v3321_v41 = vpop.permute.xlu1 %182  ;;  %v3328_v43 = vpop.permute.xlu0 %177 }
  0x8e   :  { %v3332_v44 = vmul.f32 %v3328_v43, %v3311_v37  ;;  %279 = vrot.lane.b32.xlu1 %v244_v39, %s3139_s22  ;;  %281 = vrot.lane.b32.xlu0 %v245_v40, %s3139_s22  ;;  %v3343_v46 = vmul.f32 %v3321_v41, %v3326_v42 }
  0x90   :  { %v247_v48 = vmul.f32 %v3332_v44, %v3311_v37  ;;  %v248_v55 = vmul.f32 %v3343_v46, %v3326_v42 }
  0x91   :  { %v3349_v49 = vpop.permute.xlu1 %192  ;;  %v3356_v51 = vpop.permute.xlu0 %187 }
  0x92   :  { %v3360_v52 = vmul.f32 %v3356_v51, %v3339_v45  ;;  %283 = vrot.lane.b32.xlu1 %v246_v47, %s3139_s22  ;;  %285 = vrot.lane.b32.xlu0 %v247_v48, %s3139_s22  ;;  %v3371_v54 = vmul.f32 %v3349_v49, %v3354_v50 }
  0x94   :  { %v249_v56 = vmul.f32 %v3360_v52, %v3339_v45  ;;  %v250_v63 = vmul.f32 %v3371_v54, %v3354_v50 }
  0x95   :  { %v3377_v57 = vpop.permute.xlu1 %202  ;;  %v3384_v59 = vpop.permute.xlu0 %197 }
  0x96   :  { %v3388_v60 = vmul.f32 %v3384_v59, %v3367_v53  ;;  %287 = vrot.lane.b32.xlu1 %v248_v55, %s3139_s22  ;;  %289 = vrot.lane.b32.xlu0 %v249_v56, %s3139_s22  ;;  %v3399_v62 = vmul.f32 %v3377_v57, %v3382_v58 }
  0x98   :  { %v251_v0 = vmul.f32 %v3388_v60, %v3367_v53  ;;  %v252_v7 = vmul.f32 %v3399_v62, %v3382_v58 }
  0x99   :  { %v3405_v1 = vpop.permute.xlu1 %212  ;;  %v3412_v3 = vpop.permute.xlu0 %207 }
  0x9a   :  { %4688 = vst [vmem:[#allocation2_spill] sm:$0xff] %v3405_v1  ;;  %4689 = vst [vmem:[#allocation3_spill] sm:$0xff] %v3412_v3  ;;  %v237_v4 = vmul.f32 %v3412_v3, %v3395_v61  ;;  %291 = vrot.lane.b32.xlu1 %v250_v63, %s3139_s22  ;;  %293 = vrot.lane.b32.xlu0 %v251_v0, %s3139_s22  ;;  %v238_v6 = vmul.f32 %v3405_v1, %v3410_v2 }
  0x9c   :  { %v253_v8 = vmul.f32 %v237_v4, %v3395_v61  ;;  %v254_v14 = vmul.f32 %v238_v6, %v3410_v2 }
  0x9d   :  { %v3428_v9 = vpop.permute.xlu1 %222  ;;  %v3435_v11 = vpop.permute.xlu0 %217 }
  0x9e   :  { %4690 = vst [vmem:[#allocation4_spill] sm:$0xff] %v3428_v9  ;;  %4691 = vst [vmem:[#allocation5_spill] sm:$0xff] %v3435_v11  ;;  %v239_v12 = vmul.f32 %v3435_v11, %v3421_v5  ;;  %295 = vrot.lane.b32.xlu1 %v252_v7, %s3139_s22  ;;  %297 = vrot.lane.b32.xlu0 %v253_v8, %s3139_s22  ;;  %v240_v13 = vmul.f32 %v3428_v9, %v3433_v10 }
  0xa0   :  { %v255_v15 = vmul.f32 %v239_v12, %v3421_v5  ;;  %v256_v24 = vmul.f32 %v240_v13, %v3433_v10 }
  0xa2   :  { %299 = vrot.lane.b32.xlu1 %v254_v14, %s3139_s22  ;;  %301 = vrot.lane.b32.xlu0 %v255_v15, %s3139_s22 }
  0xa6   :  { %303 = vrot.lane.b32.xlu1 %v256_v24, %s3139_s22  ;;  %86 = vperm.xlu0 %3131, %v47_v16  }
  0xf8   :  { %v274_v29 = vpop.permute.xlu0 %273 }
  0xf9   :  { %v321_v40 = vsel %vm4682_vm0, %v3257_v22, %v274_v29 }
  0xfc   :  { %v276_v32 = vpop.permute.xlu1 %275  ;;  %v278_v39 = vpop.permute.xlu0 %277 }
  0xfd   :  { %v322_v47 = vsel %vm4682_vm0, %v3277_v28, %v276_v32  ;;  %v323_v55 = vsel %vm4682_vm0, %v3253_v21, %v278_v39 }
  0xfe   :  { %v337_v48 = vadd.f32 %v322_v47, %v321_v40 }
 0x100   :  { %v338_v56 = vadd.f32 %v337_v48, %v323_v55  ;;  %v280_v63 = vpop.permute.xlu1 %279  ;;  %v282_v0 = vpop.permute.xlu0 %281 }
 0x101   :  { %v324_v7 = vsel %vm4682_vm0, %v3289_v31, %v280_v63  ;;  %v325_v14 = vsel %vm4682_vm0, %v3304_v36, %v282_v0 }
 0x102   :  { %v339_v8 = vadd.f32 %v338_v56, %v324_v7 }
 0x104   :  { %v340_v15 = vadd.f32 %v339_v8, %v325_v14  ;;  %v284_v16 = vpop.permute.xlu1 %283  ;;  %v286_v22 = vpop.permute.xlu0 %285 }
 0x105   :  { %v326_v28 = vsel %vm4682_vm0, %v3315_v38, %v284_v16  ;;  %v327_v21 = vsel %vm4682_vm0, %v3332_v44, %v286_v22 }
 0x106   :  { %v341_v24 = vadd.f32 %v340_v15, %v326_v28 }
 0x108   :  { %v342_v29 = vadd.f32 %v341_v24, %v327_v21  ;;  %v288_v32 = vpop.permute.xlu1 %287  ;;  %v290_v39 = vpop.permute.xlu0 %289 }
 0x109   :  { %v328_v31 = vsel %vm4682_vm0, %v3343_v46, %v288_v32  ;;  %v329_v36 = vsel %vm4682_vm0, %v3360_v52, %v290_v39 }
 0x10a   :  { %v343_v40 = vadd.f32 %v342_v29, %v328_v31 }
 0x10c   :  { %v344_v47 = vadd.f32 %v343_v40, %v329_v36  ;;  %v292_v48 = vpop.permute.xlu1 %291  ;;  %v294_v55 = vpop.permute.xlu0 %293 }
 0x10d   :  { %v330_v38 = vsel %vm4682_vm0, %v3371_v54, %v292_v48  ;;  %v331_v44 = vsel %vm4682_vm0, %v3388_v60, %v294_v55 }
 0x10e   :  { %v345_v56 = vadd.f32 %v344_v47, %v330_v38 }
 0x110   :  { %v346_v63 = vadd.f32 %v345_v56, %v331_v44  ;;  %v296_v0 = vpop.permute.xlu1 %295  ;;  %v298_v7 = vpop.permute.xlu0 %297  ;;  %v97_v56 = vlaneseq }
 0x111   :  { %v332_v46 = vsel %vm4682_vm0, %v3399_v62, %v296_v0  ;;  %v333_v14 = vsel %vm4682_vm0, %v237_v4, %v298_v7 }
 0x112   :  { %v347_v8 = vadd.f32 %v346_v63, %v332_v46  ;;  %v3488_v44 = vshrl.u32 %v97_v56, 7  ;;  %v3493_v63 = vld [vmem:[%s4659_s0] sm:$0xff] }
 0x114   :  { %v348_v52 = vadd.f32 %v347_v8, %v333_v14  ;;  %v300_v15 = vpop.permute.xlu1 %299  ;;  %v302_v16 = vpop.permute.xlu0 %301  ;;  %v3496_v0 = vsub.s32 1, %v3488_v44 }
 0x115   :  { %v334_v22 = vsel %vm4682_vm0, %v238_v6, %v300_v15  ;;  %v335_v54 = vsel %vm4682_vm0, %v239_v12, %v302_v16  ;;  %v29_v6 = vld [vmem:[%s4658_s2] sm:$0xff]  ;;  %v30_v15 = vld [vmem:[%s4658_s2 + $0x8] sm:$0xff] }
 0x116   :  { %v349_v28 = vadd.f32 %v348_v52, %v334_v22  ;;  %4692 = vst [vmem:[#allocation6_spill] sm:$0xff] %v3496_v0  ;;  %v414_v22 = vsub.s32 2, %v3488_v44 }
 0x118   :  { %v350_v24 = vadd.f32 %v349_v28, %v335_v54  ;;  %v304_v21 = vpop.permute.xlu1 %303  ;;  %v3519_v28 = vld [vmem:[%s4660_s5] sm:$0xff]  ;;  %v434_v54 = vsub.s32 3, %v3488_v44 }
 0x119   :  { %v336_v60 = vsel %vm4682_vm0, %v240_v13, %v304_v21 }
 0x11a   :  { %v351_v29 = vadd.f32 %v350_v24, %v336_v60  ;;  %v3527_v60 = vrot.slane %v3519_v28, %v414_v22 }
 0x11c   :  { %v352_v32 = vrot.slane %v351_v29, 4 }
 0x11e   :  { %v353_v39 = vadd.f32 %v352_v32, %v351_v29 }
 0x120   :  { %v354_v31 = vrot.slane %v353_v39, 2 }
 0x122   :  { %v355_v62 = vadd.f32 %v354_v31, %v353_v39 }
 0x124   :  { %v356_v40 = vrot.slane %v355_v62, 1 }
 0x125   :  { %v3480_v4 = vpop.permute.xlu0 %86 }
 0x126   :  { %v357_v36 = vadd.f32 %v356_v40, %v355_v62  ;;  %v3538_v62 = vrot.slane %v3519_v28, %v434_v54 }
 0x128   :  { %v358_v47 = vmul.f32 %v357_v36, %v3480_v4 }
 0x12a   :  { %v359_v48 = vmul.f32 %v358_v47, %v358_v47  ;;  %v3513_v16 = vrot.slane %v358_v47, %v3496_v0 }
 0x12c   :  { %361 = vrot.lane.b32.xlu1 %v359_v48, %s3139_s22  ;;  %v370_v24 = vsub.f32 %v3245_v18, %v3513_v16  ;;  %v371_v21 = vsub.f32 %v3262_v23, %v3513_v16  ;;  %v372_v29 = vsub.f32 %v3240_v17, %v3513_v16  ;;  %v373_v32 = vsub.f32 %v3271_v26, %v3513_v16 }
 0x12d   :  { %v374_v39 = vsub.f32 %v3285_v30, %v3513_v16  ;;  %v375_v18 = vsub.f32 %v3298_v34, %v3513_v16  ;;  %v376_v23 = vsub.f32 %v3311_v37, %v3513_v16  ;;  %v377_v17 = vsub.f32 %v3326_v42, %v3513_v16 }
 0x130   :  { %54 = vperm.xlu1 %3132, %v29_v6  }
 0x19e   :  { %v362_v12 = vpop.permute.xlu1 %361 }
 0x19f   :  { %v364_v13 = vsub.f32 %v358_v47, %v362_v12 }
 0x1a1   :  { %v365_v55 = vmax.f32 %v364_v13, 0.0 }
 0x1a3   :  { %v386_v38 = vadd.f32 1e-05, %v365_v55 }
 0x1a5   :  { %3133 = vrsqrt.f32 %v386_v38 }
 0x1af   :  { %v3134_v7 = vpop.eup %3133  ;;  %v3498_v46 = vpop.permute.xlu1 %54 }
 0x1b0   :  { %4693 = vst [vmem:[#allocation7_spill] sm:$0xff] %v3498_v46  ;;  %v3502_v8 = vmul.f32 %v3498_v46, %v3493_v63  ;;  %v391_v14 = vrot.slane %v3134_v7, %v3496_v0 }
 0x1b2   :  { %393 = vrot.lane.b32.xlu0 %v391_v14, %s3139_s22  ;;  %v64_v52 = vmul.f32 %v3502_v8, %v3493_v63 }
 0x1b4   :  { %68 = vrot.lane.b32.xlu1 %v64_v52, %s3139_s22 }
 0x1b6   :  { %59 = vperm.xlu0 %3131, %v30_v15  }
 0x224   :  { %v3535_v31 = vpop.permute.xlu0 %393 }
 0x225   :  { %v396_v40 = vmul.f32 %v3535_v31, %v370_v24  ;;  %v397_v26 = vmul.f32 %v3535_v31, %v371_v21  ;;  %v398_v30 = vmul.f32 %v3535_v31, %v372_v29  ;;  %v399_v36 = vmul.f32 %v3535_v31, %v373_v32 }
 0x226   :  { %v400_v47 = vmul.f32 %v3535_v31, %v374_v39  ;;  %v401_v48 = vmul.f32 %v3535_v31, %v375_v18  ;;  %v402_v34 = vmul.f32 %v3535_v31, %v376_v23  ;;  %v403_v6 = vmul.f32 %v3535_v31, %v377_v17 }
 0x227   :  { %v416_v37 = vmul.f32 %v3527_v60, %v396_v40  ;;  %v417_v42 = vmul.f32 %v3527_v60, %v397_v26  ;;  %v418_v12 = vmul.f32 %v3527_v60, %v398_v30  ;;  %v419_v13 = vmul.f32 %v3527_v60, %v399_v36 }
 0x228   :  { %v420_v55 = vmul.f32 %v3527_v60, %v400_v47  ;;  %v421_v38 = vmul.f32 %v3527_v60, %v401_v48  ;;  %v422_v7 = vmul.f32 %v3527_v60, %v402_v34  ;;  %v423_v22 = vmul.f32 %v3527_v60, %v403_v6 }
 0x229   :  { %v436_v14 = vadd.f32 %v3538_v62, %v416_v37  ;;  %v437_v52 = vadd.f32 %v3538_v62, %v417_v42  ;;  %v438_v15 = vadd.f32 %v3538_v62, %v418_v12  ;;  %v439_v54 = vadd.f32 %v3538_v62, %v419_v13 }
 0x22a   :  { %v440_v24 = vadd.f32 %v3538_v62, %v420_v55  ;;  %v441_v21 = vadd.f32 %v3538_v62, %v421_v38  ;;  %v378_v29 = vsub.f32 %v3339_v45, %v3513_v16  ;;  %v379_v23 = vsub.f32 %v3354_v50, %v3513_v16 }
 0x22b   :  { %v3571_v32 = vmul.f32 %v436_v14, %v3249_v20  ;;  %v3574_v39 = vmul.f32 %v437_v52, %v3273_v27  ;;  %v3577_v18 = vmul.f32 %v438_v15, %v3247_v19  ;;  %v3582_v17 = vmul.f32 %v439_v54, %v3266_v25  ;;  %v3625_v15 = vld [vmem:[%s4659_s0 + $0x8] sm:$0xff] }
 0x22c   :  { %v442_v40 = vadd.f32 %v3538_v62, %v422_v7  ;;  %v380_v45 = vsub.f32 %v3367_v53, %v3513_v16  ;;  %v381_v26 = vsub.f32 %v3382_v58, %v3513_v16  ;;  %v443_v36 = vadd.f32 %v3538_v62, %v423_v22 }
 0x22d   :  { %v2933_v30 = vpack.c.bf16 %v3574_v39, %v3571_v32  ;;  %v404_v47 = vmul.f32 %v3535_v31, %v378_v29  ;;  %v405_v50 = vmul.f32 %v3535_v31, %v379_v23  ;;  %v3595_v48 = vmul.f32 %v440_v24, %v3300_v35 }
 0x22e   :  { %v3598_v34 = vmul.f32 %v441_v21, %v3293_v33  ;;  %v406_v53 = vmul.f32 %v3535_v31, %v380_v45  ;;  %v2937_v58 = vpack.c.bf16 %v3582_v17, %v3577_v18  ;;  %v407_v42 = vmul.f32 %v3535_v31, %v381_v26 }
 0x22f   :  { %2934 = vmatprep.subr.bf16.mxu0 %v2933_v30  ;;  %v424_v6 = vmul.f32 %v3527_v60, %v404_v47  ;;  %v425_v37 = vmul.f32 %v3527_v60, %v405_v50  ;;  %v382_v12 = vsub.f32 %v3395_v61, %v3513_v16  ;;  %v3609_v13 = vmul.f32 %v442_v40, %v3328_v43 }
 0x230   :  { %2936 = vmatpush3.bf16.msra.mxu0 %v2933_v30  ;;  %v3612_v55 = vmul.f32 %v443_v36, %v3321_v41  ;;  %v383_v38 = vsub.f32 %v3410_v2, %v3513_v16  ;;  %v2941_v7 = vpack.c.bf16 %v3598_v34, %v3595_v48  ;;  %v426_v14 = vmul.f32 %v3527_v60, %v406_v53 }
 0x231   :  { %2938 = vmatprep.subr.bf16.mxu0 %v2937_v58  ;;  %v408_v52 = vmul.f32 %v3535_v31, %v382_v12  ;;  %v384_v61 = vsub.f32 %v3421_v5, %v3513_v16  ;;  %v444_v22 = vadd.f32 %v3538_v62, %v424_v6  ;;  %v445_v54 = vadd.f32 %v3538_v62, %v425_v37 }
 0x232   :  { %v427_v2 = vmul.f32 %v3527_v60, %v407_v42  ;;  %v409_v24 = vmul.f32 %v3535_v31, %v383_v38  ;;  %v385_v21 = vsub.f32 %v3433_v10, %v3513_v16  ;;  %v2945_v5 = vpack.c.bf16 %v3612_v55, %v3609_v13 }
 0x233   :  { %v410_v23 = vmul.f32 %v3535_v31, %v384_v61  ;;  %v446_v45 = vadd.f32 %v3538_v62, %v426_v14  ;;  %v428_v26 = vmul.f32 %v3527_v60, %v408_v52  ;;  %v3644_v36 = vmul.f32 %v444_v22, %v3356_v51 }
 0x234   :  { %2940 = vmatpush3.bf16.msra.mxu0 %v2937_v58  ;;  %v411_v30 = vmul.f32 %v3535_v31, %v385_v21  ;;  %v3647_v10 = vmul.f32 %v445_v54, %v3349_v49  ;;  %v447_v16 = vadd.f32 %v3538_v62, %v427_v2  ;;  %v429_v47 = vmul.f32 %v3527_v60, %v409_v24 }
 0x235   :  { %2942 = vmatprep.subr.bf16.mxu0 %v2941_v7  ;;  %v3633_v29 = vpop.permute.xlu0 %59  ;;  %v448_v53 = vadd.f32 %v3538_v62, %v428_v26  ;;  %v430_v31 = vmul.f32 %v3527_v60, %v410_v23  ;;  %v3659_v37 = vmul.f32 %v446_v45, %v3384_v59  ;;  %v3676_v61 = vand.u32 127, %v97_v56 }
 0x236   :  { %4694 = vst [vmem:[#allocation8_spill] sm:$0xff] %v3633_v29  ;;  %v63_v40 = vmul.f32 %v3633_v29, %v3625_v15  ;;  %v431_v58 = vmul.f32 %v3527_v60, %v411_v30  ;;  %v2949_v6 = vpack.c.bf16 %v3647_v10, %v3644_v36  ;;  %v3662_v42 = vmul.f32 %v447_v16, %v3377_v57 }
 0x237   :  { %v449_v12 = vadd.f32 %v3538_v62, %v429_v47  ;;  %v450_v38 = vadd.f32 %v3538_v62, %v430_v31  ;;  %v3669_v60 = vmul.f32 %v448_v53, %v3412_v3  ;;  %v3679_v22 = vshra.s32 %v3676_v61, 3 }
 0x238   :  { %2944 = vmatpush3.bf16.msra.mxu0 %v2941_v7  ;;  %v65_v50 = vmul.f32 %v63_v40, %v3625_v15  ;;  %v2953_v7 = vpack.c.bf16 %v3662_v42, %v3659_v37  ;;  %v451_v52 = vadd.f32 %v3538_v62, %v431_v58  ;;  %v4664_v56 = vmov 1.0  }
 0x239   :  { %2946 = vmatprep.subr.bf16.mxu0 %v2945_v5  ;;  %v3672_v14 = vmul.f32 %v449_v12, %v3405_v1  ;;  %v3684_v2 = vmul.f32 %v450_v38, %v3435_v11  ;;  %vm4683_vm1 = vcmp.eq.s32.totalorder %v3679_v22, %v3488_v44  ;;  %v3698_v21 = vadd.s32 8, %v3488_v44  ;;  %v730_v38 = vld [vmem:[%s4661_s6] sm:$0xff] }
 0x23a   :  { %70 = vrot.lane.b32.xlu0 %v65_v50, %s3139_s22  ;;  %v3687_v24 = vmul.f32 %v451_v52, %v3428_v9  ;;  %2594 = vmatprep.mubr.msk.f32.mxu0 %vm4683_vm1, %v4664_v56 }
 0x23b   :  { %v2957_v54 = vpack.c.bf16 %v3672_v14, %v3669_v60  ;;  %4695 = vst [vmem:[#allocation9_spill] sm:$0xff] %v3698_v21  ;;  %vm4681_vm2 = vcmp.eq.s32.totalorder %v3679_v22, %v3698_v21 }
 0x23c   :  { %2948 = vmatpush3.bf16.msra.mxu0 %v2945_v5  ;;  %v2961_v62 = vpack.c.bf16 %v3687_v24, %v3684_v2  ;;  %v69_v5 = vpop.permute.xlu1 %68 }
 0x23d   :  { %2950 = vmatprep.subr.bf16.mxu0 %v2949_v6  ;;  %v75_v45 = vsel %vm4682_vm0, %v3502_v8, %v69_v5  ;;  %v731_v8 = vld [vmem:[%s4661_s6 + $0x8] sm:$0xff] }
 0x240   :  { %2952 = vmatpush3.bf16.msra.mxu0 %v2949_v6 }
 0x241   :  { %2954 = vmatprep.subr.bf16.mxu0 %v2953_v7 }
 0x244   :  { %2956 = vmatpush3.bf16.msra.mxu0 %v2953_v7  ;;  %v2965_v7 = vpack.c.bf16 %v731_v8, %v730_v38 }
 0x245   :  { %2958 = vmatprep.subr.bf16.mxu0 %v2957_v54 }
 0x246   :  { %2966 = vmatprep.subr.bf16.mxu1 %v2965_v7 }
 0x247   :  { %2968 = vmatpush3.bf16.msra.mxu1 %v2965_v7 }
 0x248   :  { %2960 = vmatpush3.bf16.msra.mxu0 %v2957_v54 }
 0x249   :  { %2962 = vmatprep.subr.bf16.mxu0 %v2961_v62 }
 0x24c   :  { %2964 = vmatpush3.bf16.msra.mxu0 %v2961_v62 }
 0x24f   :  { %2595 = vmatmul.mubr.msk.f32.vlgmr.msra.gmra.mrb[0].mxu0 %vm4681_vm2, %v4664_v56 }
 0x2ac   :  { %v71_v23 = vpop.permute.xlu0 %70 }
 0x2ad   :  { %v76_v26 = vsel %vm4682_vm0, %v63_v40, %v71_v23  ;;  %v732_v40 = vld [vmem:[%s4661_s6 + $0x10] sm:$0xff] }
 0x2ae   :  { %v77_v30 = vadd.f32 %v76_v26, %v75_v45  ;;  %v734_v45 = vld [vmem:[%s4661_s6 + $0x20] sm:$0xff]  ;;  %v735_v26 = vld [vmem:[%s4661_s6 + $0x28] sm:$0xff] }
 0x2b0   :  { %v78_v16 = vrot.slane %v77_v30, 4 }
 0x2b2   :  { %v79_v47 = vadd.f32 %v78_v16, %v77_v30  ;;  %v2973_v30 = vpack.c.bf16 %v735_v26, %v734_v45 }
 0x2b4   :  { %v80_v50 = vrot.slane %v79_v47, 2 }
 0x2b6   :  { %v81_v53 = vadd.f32 %v80_v50, %v79_v47  ;;  %v736_v50 = vld [vmem:[%s4661_s6 + $0x30] sm:$0xff] }
 0x2b8   :  { %v82_v31 = vrot.slane %v81_v53, 1 }
 0x2ba   :  { %v83_v58 = vadd.f32 %v82_v31, %v81_v53  ;;  %v737_v53 = vld [vmem:[%s4661_s6 + $0x38] sm:$0xff]  ;;  %v3736_v31 = vsub.s32 0, %v3488_v44 }
 0x2bc   :  { %v89_v6 = vmul.f32 %v3480_v4, %v83_v58  ;;  %v733_v4 = vld [vmem:[%s4661_s6 + $0x18] sm:$0xff]  ;;  %4696 = vst [vmem:[#allocation10_spill] sm:$0xff] %v3736_v31  ;;  %v2977_v58 = vpack.c.bf16 %v737_v53, %v736_v50 }
 0x2bd   :  { %v2969_v52 = vpack.c.bf16 %v733_v4, %v732_v40  ;;  %v118_v4 = vrot.slane %v3519_v28, %v3736_v31 }
 0x2be   :  { %v90_v12 = vmul.f32 %v89_v6, %v89_v6  ;;  %v100_v8 = vrot.slane %v89_v6, %v3736_v31 }
 0x2bf   :  { %2970 = vmatprep.subr.bf16.mxu1 %v2969_v52 }
 0x2c0   :  { %92 = vrot.lane.b32.xlu1 %v90_v12, %s3139_s22  ;;  %2972 = vmatpush3.bf16.msra.mxu1 %v2969_v52  ;;  %v101_v40 = vsub.f32 %v3493_v63, %v100_v8  ;;  %v102_v7 = vsub.f32 %v3625_v15, %v100_v8  ;;  %v492_v15 = vshra.s32 %v3488_v44, 3  ;;  %v4678_v8 = vmov 0.0  }
 0x2c1   :  { %2974 = vmatprep.subr.bf16.mxu1 %v2973_v30 }
 0x2c2   :  { %vm508_vm3 = vcmp.eq.s32.totalorder %v492_v15, %v3676_v61 }
 0x2c4   :  { %2976 = vmatpush3.bf16.msra.mxu1 %v2973_v30 }
 0x2c5   :  { %2978 = vmatprep.subr.bf16.mxu1 %v2977_v58 }
 0x2c8   :  { %2980 = vmatpush3.bf16.msra.mxu1 %v2977_v58  ;;  %v540_v58 = vshra.s32 %v3488_v44, 6 }
 0x2ca   :  { %vm556_vm4 = vcmp.eq.s32.totalorder %v540_v58, %v3679_v22 }
 0x322   :  { %v2596_v16 = vpop.f32.mrb[0].mxu0 }
 0x323   :  { %v719_v47 = vpop.f32.mrb[1].mxu0 }
 0x332   :  { %v93_v54 = vpop.permute.xlu1 %92 }
 0x333   :  { %v95_v62 = vsub.f32 %v89_v6, %v93_v54 }
 0x335   :  { %v96_v5 = vmax.f32 %v95_v62, 0.0 }
 0x337   :  { %v103_v23 = vadd.f32 1e-05, %v96_v5  ;;  %v124_v5 = vrot.slane %v3519_v28, %v3496_v0 }
 0x339   :  { %3135 = vrsqrt.f32 %v103_v23 }
 0x343   :  { %v3136_v12 = vpop.eup %3135 }
 0x344   :  { %v108_v38 = vrot.slane %v3136_v12, %v3736_v31  ;;  %v572_v12 = vand.u32 7, %v3488_v44 }
 0x346   :  { %110 = vrot.lane.b32.xlu0 %v108_v38, %s3139_s22  ;;  %v3755_v38 = vand.u32 7, %v3676_v61 }
 0x348   :  { %vm589_vm5 = vcmp.eq.s32.totalorder %v572_v12, %v3755_v38  ;;  %v740_v12 = vsub.s32 4, %v3488_v44 }
 0x349   :  { %vm605_vm6 = vmand %vm556_vm4, %vm589_vm5 }
 0x3b8   :  { %v111_v52 = vpop.permute.xlu0 %110 }
 0x3b9   :  { %v113_v54 = vmul.f32 %v111_v52, %v101_v40  ;;  %v114_v62 = vmul.f32 %v111_v52, %v102_v7  ;;  %v2263_v7 = vld [vmem:[%s4661_s6 + $0x80] sm:$0xff]  ;;  %v2265_v52 = vld [vmem:[%s4661_s6 + $0x90] sm:$0xff] }
 0x3bb   :  { %v119_v23 = vmul.f32 %v118_v4, %v113_v54  ;;  %v120_v45 = vmul.f32 %v118_v4, %v114_v62  ;;  %v2264_v4 = vld [vmem:[%s4661_s6 + $0x88] sm:$0xff]  ;;  %v2266_v54 = vld [vmem:[%s4661_s6 + $0x98] sm:$0xff] }
 0x3bc   :  { %v2985_v62 = vpack.c.bf16 %v2264_v4, %v2263_v7  ;;  %v480_v7 = vadd.s32 32, %v3488_v44 }
 0x3bd   :  { %v126_v26 = vadd.f32 %v124_v5, %v120_v45  ;;  %v125_v30 = vadd.f32 %v124_v5, %v119_v23  ;;  %v2267_v5 = vld [vmem:[%s4661_s6 + $0xa0] sm:$0xff]  ;;  %v2268_v23 = vld [vmem:[%s4661_s6 + $0xa8] sm:$0xff]  ;;  %v2989_v45 = vpack.c.bf16 %v2266_v54, %v2265_v52 }
 0x3be   :  { %2986 = vmatprep.subr.bf16.mxu0 %v2985_v62 }
 0x3bf   :  { %v128_v50 = vmul.f32 %v126_v26, %v3633_v29  ;;  %v127_v6 = vmul.f32 %v125_v30, %v3498_v46  ;;  %2988 = vmatpush3.bf16.msra.mxu0 %v2985_v62  ;;  %v2993_v26 = vpack.c.bf16 %v2268_v23, %v2267_v5  ;;  %v478_v30 = vadd.s32 16, %v3488_v44 }
 0x3c0   :  { %2990 = vmatprep.subr.bf16.mxu0 %v2989_v45 }
 0x3c1   :  { %v729_v63 = vadd.f32 %v2596_v16, %v128_v50  ;;  %v728_v53 = vadd.f32 %v719_v47, %v127_v6  ;;  %v524_v16 = vsel %vm508_vm3, 1.0, %v4678_v8  ;;  %v621_v47 = vsel %vm605_vm6, 1.0, %v4678_v8 }
 0x3c2   :  { %v3762_v40 = vadd.f32 %v621_v47, %v524_v16  ;;  %v479_v50 = vadd.s32 24, %v3488_v44  ;;  %v541_v6 = vshra.s32 %v3698_v21, 6  ;;  %v542_v15 = vshra.s32 %v478_v30, 6 }
 0x3c3   :  { %2613 = vmatprep.mubr.msk.f32.mxu1 %vm4682_vm0, %v728_v53  ;;  %2992 = vmatpush3.bf16.msra.mxu0 %v2989_v45  ;;  %v493_v53 = vshra.s32 %v3698_v21, 3  ;;  %v574_v58 = vand.u32 7, %v478_v30  ;;  %v494_v54 = vshra.s32 %v478_v30, 3  ;;  %v544_v30 = vshra.s32 %v480_v7, 6 }
 0x3c4   :  { %2614 = vmatmul.mubr.msk.f32.vlgmr.msra.gmra.mrb[0].mxu1 %vm4682_vm0, %v729_v63  ;;  %4697 = vst [vmem:[#allocation11_spill] sm:$0xff] %v3762_v40  ;;  %2994 = vmatprep.subr.bf16.mxu0 %v2993_v26  ;;  %v573_v63 = vand.u32 7, %v3698_v21  ;;  %v543_v16 = vshra.s32 %v479_v50, 6  ;;  %v575_v47 = vand.u32 7, %v479_v50  ;;  %vm3792_vm8 = vcmp.eq.s32.totalorder %v541_v6, %v3679_v22 }
 0x3c5   :  { %2620 = vmatprep.mubr.msk.f32.mxu1 %vm827_vm7, %v3762_v40  ;;  %v495_v62 = vshra.s32 %v479_v50, 3  ;;  %vm509_vm10 = vcmp.eq.s32.totalorder %v493_v53, %v3676_v61  ;;  %vm3803_vm11 = vcmp.eq.s32.totalorder %v542_v15, %v3679_v22  ;;  %vm3808_vm12 = vcmp.eq.s32.totalorder %v574_v58, %v3755_v38 }
 0x3c6   :  { %vm3797_vm9 = vcmp.eq.s32.totalorder %v573_v63, %v3755_v38  ;;  %vm3817_vm14 = vcmp.eq.s32.totalorder %v543_v16, %v3679_v22  ;;  %vm3822_vm15 = vcmp.eq.s32.totalorder %v575_v47, %v3755_v38  ;;  %v576_v50 = vand.u32 7, %v480_v7  ;;  %vm607_vm5 = vmand %vm3803_vm11, %vm3808_vm12 }
 0x3c7   :  { %2996 = vmatpush3.bf16.msra.mxu0 %v2993_v26  ;;  %vm606_vm13 = vmand %vm3792_vm8, %vm3797_vm9  ;;  %v741_v6 = vrot.slane %v3519_v28, %v740_v12  ;;  %vm510_vm3 = vcmp.eq.s32.totalorder %v494_v54, %v3676_v61  ;;  %vm511_vm4 = vcmp.eq.s32.totalorder %v495_v62, %v3676_v61  ;;  %v496_v63 = vshra.s32 %v480_v7, 3 }
 0x3c8   :  { %v481_v53 = vadd.s32 40, %v3488_v44  ;;  %v525_v15 = vsel %vm509_vm10, 1.0, %v4678_v8  ;;  %v622_v58 = vsel %vm606_vm13, 1.0, %v4678_v8  ;;  %vm608_vm6 = vmand %vm3817_vm14, %vm3822_vm15  ;;  %v482_v12 = vadd.s32 48, %v3488_v44 }
 0x3c9   :  { %v483_v16 = vadd.s32 56, %v3488_v44  ;;  %v526_v7 = vsel %vm510_vm3, 1.0, %v4678_v8  ;;  %v527_v4 = vsel %vm511_vm4, 1.0, %v4678_v8  ;;  %vm3845_vm8 = vcmp.eq.s32.totalorder %v544_v30, %v3679_v22 }
 0x3ca   :  { %vm3850_vm9 = vcmp.eq.s32.totalorder %v576_v50, %v3755_v38  ;;  %v623_v23 = vsel %vm607_vm5, 1.0, %v4678_v8  ;;  %vm512_vm10 = vcmp.eq.s32.totalorder %v496_v63, %v3676_v61  ;;  %v484_v45 = vadd.s32 64, %v3488_v44 }
 0x3cb   :  { %v624_v56 = vsel %vm608_vm6, 1.0, %v4678_v8  ;;  %v545_v30 = vshra.s32 %v481_v53, 6  ;;  %v577_v0 = vand.u32 7, %v481_v53  ;;  %vm609_vm11 = vmand %vm3845_vm8, %vm3850_vm9  ;;  %v546_v50 = vshra.s32 %v482_v12, 6 }
 0x3cc   :  { %v547_v40 = vshra.s32 %v483_v16, 6  ;;  %v528_v11 = vsel %vm512_vm10, 1.0, %v4678_v8  ;;  %v497_v63 = vshra.s32 %v481_v53, 3  ;;  %v579_v9 = vand.u32 7, %v483_v16 }
 0x3cd   :  { %v548_v3 = vshra.s32 %v484_v45, 6  ;;  %v580_v1 = vand.u32 7, %v484_v45  ;;  %v625_v52 = vsel %vm609_vm11, 1.0, %v4678_v8  ;;  %vm3871_vm12 = vcmp.eq.s32.totalorder %v545_v30, %v3679_v22 }
 0x3ce   :  { %vm3876_vm13 = vcmp.eq.s32.totalorder %v577_v0, %v3755_v38  ;;  %vm3881_vm14 = vcmp.eq.s32.totalorder %v546_v50, %v3679_v22  ;;  %vm3891_vm3 = vcmp.eq.s32.totalorder %v547_v40, %v3679_v22  ;;  %vm3898_vm4 = vcmp.eq.s32.totalorder %v579_v9, %v3755_v38 }
 0x3cf   :  { %v500_v50 = vshra.s32 %v484_v45, 3  ;;  %vm3904_vm5 = vcmp.eq.s32.totalorder %v497_v63, %v3676_v61  ;;  %vm610_vm6 = vmand %vm3871_vm12, %vm3876_vm13  ;;  %vm3913_vm8 = vcmp.eq.s32.totalorder %v548_v3, %v3679_v22  ;;  %vm3918_vm9 = vcmp.eq.s32.totalorder %v580_v1, %v3755_v38 }
 0x3d0   :  { %v3923_v45 = vadd.f32 %v622_v58, %v525_v15  ;;  %v3925_v63 = vadd.f32 %v623_v23, %v526_v7  ;;  %v3931_v3 = vadd.f32 %v624_v56, %v527_v4  ;;  %vm612_vm0 = vmand %vm3891_vm3, %vm3898_vm4  ;;  %v4735_v1 = vmov 0.0  }
 0x3d1   :  { %v529_v15 = vsel %vm3904_vm5, 1.0, %v4735_v1  ;;  %vm516_vm1 = vcmp.eq.s32.totalorder %v500_v50, %v3676_v61  ;;  %vm613_vm10 = vmand %vm3913_vm8, %vm3918_vm9  ;;  %v626_v58 = vsel %vm610_vm6, 1.0, %v4735_v1  ;;  %v487_v8 = vadd.s32 88, %v3488_v44 }
 0x3d2   :  { %4733 = vst [vmem:[#allocation13_spill] sm:$0xff] %v3923_v45  ;;  %4734 = vst [vmem:[#allocation14_spill] sm:$0xff] %v3925_v63  ;;  %v488_v54 = vadd.s32 96, %v3488_v44  ;;  %v628_v53 = vsel %vm612_vm0, 1.0, %v4735_v1  ;;  %v489_v30 = vadd.s32 104, %v3488_v44 }
 0x3d3   :  { %v551_v9 = vshra.s32 %v487_v8, 6 }
 0x3d4   :  { %v505_v50 = vshra.s32 %v489_v30, 3 }
 0x3d5   :  { %vm4030_vm4 = vcmp.eq.s32.totalorder %v551_v9, %v3679_v22 }
 0x497   :  { %v2615_v47 = vpop.f32.mrb[0].mxu1 }
 0x498   :  { %v820_v62 = vadd.f32 %v2615_v47, %v741_v6  ;;  %v814_v5 = vpop.f32.mrb[1].mxu1  ;;  %v578_v47 = vand.u32 7, %v482_v12 }
 0x499   :  { %v815_v26 = vadd.f32 %v814_v5, %v741_v6  ;;  %v498_v5 = vshra.s32 %v482_v12, 3  ;;  %v499_v12 = vshra.s32 %v483_v16, 3  ;;  %v486_v16 = vadd.s32 80, %v3488_v44 }
 0x49a   :  { %v824_v31 = vmax.f32 %v820_v62, 0.0  ;;  %vm3886_vm15 = vcmp.eq.s32.totalorder %v578_v47, %v3755_v38  ;;  %v485_v47 = vadd.s32 72, %v3488_v44 }
 0x49b   :  { %v823_v21 = vmax.f32 %v815_v26, 0.0  ;;  %vm514_vm11 = vcmp.eq.s32.totalorder %v498_v5, %v3676_v61  ;;  %vm515_vm2 = vcmp.eq.s32.totalorder %v499_v12, %v3676_v61  ;;  %v550_v7 = vshra.s32 %v486_v16, 6  ;;  %vm4736_vm5 = vmand %vm3881_vm14, %vm3886_vm15 }
 0x49c   :  { %v3864_v6 = vmul.f32 %v824_v31, %v3633_v29  ;;  %v581_v56 = vand.u32 7, %v485_v47  ;;  %v582_v4 = vand.u32 7, %v486_v16  ;;  %v530_v23 = vsel %vm514_vm11, 1.0, %v4735_v1 }
 0x49d   :  { %v3867_v62 = vmul.f32 %v823_v21, %v3498_v46  ;;  %v3933_v46 = vadd.f32 %v625_v52, %v528_v11  ;;  %v549_v11 = vshra.s32 %v485_v47, 6  ;;  %v627_v5 = vsel %vm4736_vm5, 1.0, %v4735_v1 }
 0x49e   :  { %4714 = vst [vmem:[#allocation12_spill] sm:$0xff] %v3864_v6  ;;  %v531_v52 = vsel %vm515_vm2, 1.0, %v4735_v1  ;;  %v532_v31 = vsel %vm516_vm1, 1.0, %v4735_v1  ;;  %v629_v21 = vsel %vm613_vm10, 1.0, %v4735_v1  ;;  %v501_v12 = vshra.s32 %v485_v47, 3 }
 0x49f   :  { %v2981_v0 = vpack.c.bf16 %v3864_v6, %v3867_v62  ;;  %vm3978_vm12 = vcmp.eq.s32.totalorder %v549_v11, %v3679_v22  ;;  %vm3983_vm2 = vcmp.eq.s32.totalorder %v581_v56, %v3755_v38  ;;  %v502_v26 = vshra.s32 %v486_v16, 3 }
 0x4a0   :  { %vm3989_vm0 = vcmp.eq.s32.totalorder %v550_v7, %v3679_v22  ;;  %vm3994_vm1 = vcmp.eq.s32.totalorder %v582_v4, %v3755_v38  ;;  %v583_v11 = vand.u32 7, %v487_v8  ;;  %v4000_v56 = vadd.f32 %v626_v58, %v529_v15  ;;  %vm614_vm14 = vmand %vm3978_vm12, %vm3983_vm2 }
 0x4a1   :  { %2982 = vmatprep.subr.bf16.mxu1 %v2981_v0  ;;  %v552_v16 = vshra.s32 %v488_v54, 6  ;;  %v4005_v7 = vadd.f32 %v627_v5, %v530_v23  ;;  %v4007_v4 = vadd.f32 %v628_v53, %v531_v52  ;;  %v4009_v29 = vadd.f32 %v629_v21, %v532_v31  ;;  %vm615_vm3 = vmand %vm3989_vm0, %vm3994_vm1 }
 0x4a2   :  { %2984 = vmatpush3.bf16.msra.mxu1 %v2981_v0  ;;  %vm4012_vm13 = vcmp.eq.s32.totalorder %v501_v12, %v3676_v61  ;;  %vm4021_vm15 = vcmp.eq.s32.totalorder %v502_v26, %v3676_v61  ;;  %v503_v58 = vshra.s32 %v487_v8, 3  ;;  %v504_v23 = vshra.s32 %v488_v54, 3 }
 0x4a3   :  { %v553_v5 = vshra.s32 %v489_v30, 6  ;;  %vm4035_vm6 = vcmp.eq.s32.totalorder %v583_v11, %v3755_v38  ;;  %v585_v31 = vand.u32 7, %v489_v30  ;;  %v491_v21 = vadd.s32 120, %v3488_v44 }
 0x4a4   :  { %vm4043_vm8 = vcmp.eq.s32.totalorder %v552_v16, %v3679_v22  ;;  %v533_v9 = vsel %vm4012_vm13, 1.0, %v4735_v1  ;;  %v630_v11 = vsel %vm614_vm14, 1.0, %v4735_v1  ;;  %v631_v16 = vsel %vm615_vm3, 1.0, %v4735_v1  ;;  %vm616_vm11 = vmand %vm4030_vm4, %vm4035_vm6 }
 0x4a5   :  { %2621 = vmatmul.mubr.msk.f32.vlgmr.msra.gmra.mrb[2].mxu1 %vm827_vm7, %v3923_v45  ;;  %v490_v45 = vadd.s32 112, %v3488_v44  ;;  %vm4073_vm10 = vcmp.eq.s32.totalorder %v503_v58, %v3676_v61  ;;  %vm4082_vm5 = vcmp.eq.s32.totalorder %v504_v23, %v3676_v61  ;;  %vm4087_vm12 = vcmp.eq.s32.totalorder %v553_v5, %v3679_v22 }
 0x4a6   :  { %2623 = vmatprep.mubr.msk.f32.mxu1 %vm827_vm7, %v3925_v63  ;;  %v584_v63 = vand.u32 7, %v488_v54  ;;  %vm4096_vm0 = vcmp.eq.s32.totalorder %v585_v31, %v3755_v38  ;;  %v555_v58 = vshra.s32 %v491_v21, 6  ;;  %v587_v23 = vand.u32 7, %v491_v21 }
 0x4a7   :  { %v554_v12 = vshra.s32 %v490_v45, 6  ;;  %v586_v26 = vand.u32 7, %v490_v45  ;;  %v506_v15 = vshra.s32 %v490_v45, 3  ;;  %v4102_v30 = vadd.f32 %v630_v11, %v533_v9 }
 0x4a8   :  { %vm4048_vm9 = vcmp.eq.s32.totalorder %v584_v63, %v3755_v38  ;;  %v534_v63 = vsel %vm4021_vm15, 1.0, %v4735_v1  ;;  %v535_v31 = vsel %vm4073_vm10, 1.0, %v4735_v1  ;;  %v632_v54 = vsel %vm616_vm11, 1.0, %v4735_v1  ;;  %vm618_vm15 = vmand %vm4087_vm12, %vm4096_vm0 }
 0x4a9   :  { %2624 = vmatmul.mubr.msk.f32.gmra.mrb[4].mxu1 %vm827_vm7, %v3931_v3  ;;  %vm617_vm2 = vmand %vm4043_vm8, %vm4048_vm9  ;;  %vm4105_vm1 = vcmp.eq.s32.totalorder %v554_v12, %v3679_v22  ;;  %vm4110_vm13 = vcmp.eq.s32.totalorder %v586_v26, %v3755_v38  ;;  %v4116_v45 = vadd.f32 %v631_v16, %v534_v63  ;;  %v536_v12 = vsel %vm4082_vm5, 1.0, %v4735_v1 }
 0x4aa   :  { %2626 = vmatprep.mubr.msk.f32.mxu1 %vm827_vm7, %v3933_v46  ;;  %v633_v26 = vsel %vm617_vm2, 1.0, %v4735_v1  ;;  %vm521_vm14 = vcmp.eq.s32.totalorder %v505_v50, %v3676_v61  ;;  %v507_v9 = vshra.s32 %v491_v21, 3  ;;  %vm522_vm3 = vcmp.eq.s32.totalorder %v506_v15, %v3676_v61  ;;  %vm619_vm4 = vmand %vm4105_vm1, %vm4110_vm13 }
 0x4ab   :  { %vm4142_vm6 = vcmp.eq.s32.totalorder %v555_v58, %v3679_v22  ;;  %vm4147_vm8 = vcmp.eq.s32.totalorder %v587_v23, %v3755_v38  ;;  %v4153_v21 = vadd.f32 %v632_v54, %v535_v31  ;;  %v4157_v11 = vadd.f32 %v633_v26, %v536_v12  ;;  %v2269_v58 = vld [vmem:[%s4661_s6 + $0xb0] sm:$0xff]  ;;  %v2270_v23 = vld [vmem:[%s4661_s6 + $0xb8] sm:$0xff] }
 0x4ac   :  { %v537_v63 = vsel %vm521_vm14, 1.0, %v4735_v1  ;;  %v634_v16 = vsel %vm618_vm15, 1.0, %v4735_v1  ;;  %v538_v6 = vsel %vm522_vm3, 1.0, %v4735_v1  ;;  %v635_v38 = vsel %vm619_vm4, 1.0, %v4735_v1  ;;  %vm620_vm10 = vmand %vm4142_vm6, %vm4147_vm8 }
 0x4ad   :  { %2627 = vmatmul.mubr.msk.f32.gmra.mrb[6].mxu1 %vm827_vm7, %v4000_v56  ;;  %vm523_vm9 = vcmp.eq.s32.totalorder %v507_v9, %v3676_v61  ;;  %v4170_v0 = vadd.f32 %v634_v16, %v537_v63  ;;  %v4174_v50 = vadd.f32 %v635_v38, %v538_v6  ;;  %v636_v47 = vsel %vm620_vm10, 1.0, %v4735_v1 }
 0x4ae   :  { %2629 = vmatprep.mubr.msk.f32.mxu1 %vm827_vm7, %v4005_v7  ;;  %v539_v40 = vsel %vm523_vm9, 1.0, %v4735_v1  ;;  %v4773_v15 = vmov 1.0   ;;  %vm4774_vm11 = vcmp.eq.s32.totalorder %v3679_v22, %v3488_v44  ;;  %v2997_v5 = vpack.c.bf16 %v2270_v23, %v2269_v58 }
 0x4af   :  { %v4180_v61 = vadd.f32 %v636_v47, %v539_v40  ;;  %vm4775_vm5 = vcmask 523264  }
 0x4b0   :  { %2998 = vmatprep.subr.bf16.mxu0 %v2997_v5  ;;  %vm4776_vm12 = vmmov %vm4775_vm5 }
 0x4b1   :  { %2630 = vmatmul.mubr.msk.f32.gmra.mrb[8].mxu1 %vm827_vm7, %v4007_v4  ;;  %3000 = vmatpush3.bf16.msra.mxu0 %v2997_v5  ;;  %vm4777_vm2 = vmmov %vm4775_vm5 }
 0x4b2   :  { %2632 = vmatprep.mubr.msk.f32.mxu1 %vm827_vm7, %v4009_v29  ;;  %vm4778_vm0 = vmmov %vm4777_vm2 }
 0x4b3   :  { %vm4779_vm1 = vmmov %vm4778_vm0 }
 0x4b4   :  { %vm4780_vm13 = vmmov %vm4778_vm0 }
 0x4b5   :  { %2633 = vmatmul.mubr.msk.f32.gmra.mrb[10].mxu1 %vm827_vm7, %v4102_v30  ;;  %vm4781_vm14 = vmmov %vm4778_vm0 }
 0x4b6   :  { %2635 = vmatprep.mubr.msk.f32.mxu1 %vm827_vm7, %v4116_v45  ;;  %vm4782_vm15 = vmmov %vm4778_vm0 }
 0x4b7   :  { %vm4783_vm3 = vmmov %vm4778_vm0 }
 0x4b8   :  { %vm4784_vm4 = vmmov %vm4778_vm0 }
 0x4b9   :  { %2636 = vmatmul.mubr.msk.f32.gmra.mrb[12].mxu1 %vm827_vm7, %v4153_v21  ;;  %vm4785_vm6 = vmmov %vm4778_vm0 }
 0x4ba   :  { %2638 = vmatprep.mubr.msk.f32.mxu1 %vm827_vm7, %v4157_v11  ;;  %vm4786_vm8 = vmmov %vm4778_vm0 }
 0x4bb   :  { %vm4787_vm9 = vmmov %vm4778_vm0 }
 0x4bc   :  { %vm4788_vm10 = vmmov %vm4778_vm0 }
 0x4bd   :  { %2639 = vmatmul.mubr.msk.f32.gmra.mrb[14].mxu1 %vm827_vm7, %v4170_v0 }
 0x4be   :  { %2641 = vmatprep.mubr.msk.f32.mxu1 %vm827_vm7, %v4174_v50 }
 0x4c1   :  { %2642 = vmatmul.mubr.msk.f32.gmra.mrb[16].mxu1 %vm827_vm7, %v4180_v61 }
 0x4c2   :  { %2716 = vmatprep.mubr.msk.f32.mxu1 %vm4774_vm11, %v4773_v15  ;;  %vm4789_vm11 = vmmov %vm4778_vm0 }
 0x578   :  { %v2622_v8 = vpop.f32.mrb[2].mxu1 }
 0x579   :  { %v942_v31 = vpop.f32.mrb[3].mxu1  ;;  %v1022_v12 = vadd.f32 %v2622_v8, %v3574_v39 }
 0x57a   :  { %v1021_v54 = vadd.f32 %v942_v31, %v3571_v32 }
 0x57c   :  { %v2625_v26 = vpop.f32.mrb[4].mxu1  ;;  %2660 = vmatprep.mubr.msk.f32.mxu0 %vm4775_vm5, %v1021_v54  ;;  %vm4790_vm5 = vmmov %vm4778_vm0 }
 0x57d   :  { %v952_v9 = vpop.f32.mrb[5].mxu1  ;;  %2661 = vmatmul.mubr.msk.f32.vlgmr.msra.gmra.mrb[2].mxu0 %vm4776_vm12, %v1022_v12  ;;  %v1024_v53 = vadd.f32 %v2625_v26, %v3582_v17  ;;  %v1048_v12 = vsub.s32 6, %v3488_v44 }
 0x57e   :  { %v1023_v52 = vadd.f32 %v952_v9, %v3577_v18 }
 0x580   :  { %v2628_v63 = vpop.f32.mrb[6].mxu1  ;;  %2663 = vmatprep.mubr.msk.f32.mxu0 %vm4777_vm2, %v1023_v52  ;;  %vm4798_vm2 = vmmov %vm4778_vm0 }
 0x581   :  { %v962_v16 = vpop.f32.mrb[7].mxu1  ;;  %2664 = vmatmul.mubr.msk.f32.gmra.mrb[4].mxu0 %vm4778_vm0, %v1024_v53  ;;  %v1026_v39 = vadd.f32 %v2628_v63, %v3598_v34 }
 0x582   :  { %v1025_v32 = vadd.f32 %v962_v16, %v3595_v48 }
 0x584   :  { %v2631_v6 = vpop.f32.mrb[8].mxu1  ;;  %2666 = vmatprep.mubr.msk.f32.mxu0 %vm4779_vm1, %v1025_v32  ;;  %vm4804_vm1 = vmmov %vm4778_vm0 }
 0x585   :  { %v972_v38 = vpop.f32.mrb[9].mxu1  ;;  %2667 = vmatmul.mubr.msk.f32.gmra.mrb[6].mxu0 %vm4780_vm13, %v1026_v39  ;;  %v1028_v17 = vadd.f32 %v2631_v6, %v3612_v55  ;;  %vm4805_vm13 = vmmov %vm4778_vm0 }
 0x586   :  { %v1027_v18 = vadd.f32 %v972_v38, %v3609_v13 }
 0x588   :  { %v2634_v40 = vpop.f32.mrb[10].mxu1  ;;  %2669 = vmatprep.mubr.msk.f32.mxu0 %vm4781_vm14, %v1027_v18  ;;  %vm4806_vm14 = vmmov %vm4778_vm0 }
 0x589   :  { %v982_v47 = vpop.f32.mrb[11].mxu1  ;;  %2670 = vmatmul.mubr.msk.f32.gmra.mrb[8].mxu0 %vm4782_vm15, %v1028_v17  ;;  %v1030_v34 = vadd.f32 %v2634_v40, %v3647_v10  ;;  %vm4808_vm15 = vmmov %vm4778_vm0 }
 0x58a   :  { %v1029_v48 = vadd.f32 %v982_v47, %v3644_v36 }
 0x58c   :  { %v2637_v58 = vpop.f32.mrb[12].mxu1  ;;  %2672 = vmatprep.mubr.msk.f32.mxu0 %vm4783_vm3, %v1029_v48  ;;  %vm4809_vm3 = vmmov %vm4778_vm0 }
 0x58d   :  { %v992_v23 = vpop.f32.mrb[13].mxu1  ;;  %2673 = vmatmul.mubr.msk.f32.gmra.mrb[10].mxu0 %vm4784_vm4, %v1030_v34  ;;  %v1032_v55 = vadd.f32 %v2637_v58, %v3662_v42  ;;  %vm4810_vm4 = vmmov %vm4778_vm0 }
 0x58e   :  { %v1031_v13 = vadd.f32 %v992_v23, %v3659_v37 }
 0x590   :  { %v2640_v5 = vpop.f32.mrb[14].mxu1  ;;  %2675 = vmatprep.mubr.msk.f32.mxu0 %vm4785_vm6, %v1031_v13  ;;  %vm4811_vm6 = vmmov %vm4778_vm0 }
 0x591   :  { %v1002_v8 = vpop.f32.mrb[15].mxu1  ;;  %2676 = vmatmul.mubr.msk.f32.gmra.mrb[12].mxu0 %vm4786_vm8, %v1032_v55  ;;  %v1034_v10 = vadd.f32 %v2640_v5, %v3672_v14  ;;  %vm4812_vm8 = vmmov %vm4778_vm0 }
 0x592   :  { %v1033_v36 = vadd.f32 %v1002_v8, %v3669_v60  ;;  %v4230_v60 = vrot.slane %v3519_v28, %v1048_v12 }
 0x594   :  { %v2643_v31 = vpop.f32.mrb[16].mxu1  ;;  %2678 = vmatprep.mubr.msk.f32.mxu0 %vm4787_vm9, %v1033_v36  ;;  %vm4813_vm9 = vmmov %vm4778_vm0 }
 0x595   :  { %v1012_v54 = vpop.f32.mrb[17].mxu1  ;;  %2679 = vmatmul.mubr.msk.f32.gmra.mrb[14].mxu0 %vm4788_vm10, %v1034_v10  ;;  %v1036_v42 = vadd.f32 %v2643_v31, %v3687_v24  ;;  %vm4814_vm10 = vmmov %vm4778_vm0 }
 0x596   :  { %v1035_v37 = vadd.f32 %v1012_v54, %v3684_v2 }
 0x598   :  { %2681 = vmatprep.mubr.msk.f32.mxu0 %vm4789_vm11, %v1035_v37  ;;  %vm4815_vm11 = vmmov %vm4778_vm0 }
 0x599   :  { %2682 = vmatmul.mubr.msk.f32.gmra.mrb[16].mxu0 %vm4790_vm5, %v1036_v42  ;;  %vm4816_vm5 = vmmov %vm4778_vm0 }
 0x650   :  { %v2662_v14 = vpop.f32.mrb[2].mxu0 }
 0x651   :  { %v1170_v26 = vadd.f32 %v2662_v14, %v4230_v60  ;;  %v1164_v9 = vpop.f32.mrb[3].mxu0 }
 0x652   :  { %v1165_v52 = vadd.f32 %v1164_v9, %v4230_v60 }
 0x653   :  { %v1244_v53 = vmax.f32 %v1170_v26, 0.0 }
 0x654   :  { %v1243_v63 = vmax.f32 %v1165_v52, 0.0  ;;  %v2665_v2 = vpop.f32.mrb[4].mxu0 }
 0x655   :  { %v4235_v24 = vmul.f32 %v1244_v53, %v3273_v27  ;;  %v1180_v16 = vadd.f32 %v2665_v2, %v4230_v60  ;;  %v1174_v32 = vpop.f32.mrb[5].mxu0 }
 0x656   :  { %v4239_v39 = vmul.f32 %v1243_v63, %v3249_v20  ;;  %v1175_v28 = vadd.f32 %v1174_v32, %v4230_v60 }
 0x657   :  { %v1246_v6 = vmax.f32 %v1180_v16, 0.0 }
 0x658   :  { %v1245_v38 = vmax.f32 %v1175_v28, 0.0  ;;  %v2668_v18 = vpop.f32.mrb[6].mxu0  ;;  %v3001_v17 = vpack.c.bf16 %v4235_v24, %v4239_v39 }
 0x659   :  { %v4245_v40 = vmul.f32 %v1246_v6, %v3266_v25  ;;  %v1190_v47 = vadd.f32 %v2668_v18, %v4230_v60  ;;  %v1184_v48 = vpop.f32.mrb[7].mxu0 }
 0x65a   :  { %v4249_v34 = vmul.f32 %v1245_v38, %v3247_v19  ;;  %v1185_v58 = vadd.f32 %v1184_v48, %v4230_v60  ;;  %3002 = vmatprep.subr.bf16.mxu1 %v3001_v17 }
 0x65b   :  { %v1248_v23 = vmax.f32 %v1190_v47, 0.0  ;;  %3004 = vmatpush3.bf16.msra.mxu1 %v3001_v17 }
 0x65c   :  { %v1247_v13 = vmax.f32 %v1185_v58, 0.0  ;;  %v2671_v55 = vpop.f32.mrb[8].mxu0  ;;  %v3005_v5 = vpack.c.bf16 %v4245_v40, %v4249_v34 }
 0x65d   :  { %v4255_v8 = vmul.f32 %v1248_v23, %v3293_v33  ;;  %v1200_v36 = vadd.f32 %v2671_v55, %v4230_v60  ;;  %v1194_v10 = vpop.f32.mrb[9].mxu0 }
 0x65e   :  { %v4259_v31 = vmul.f32 %v1247_v13, %v3300_v35  ;;  %v1195_v54 = vadd.f32 %v1194_v10, %v4230_v60  ;;  %3006 = vmatprep.subr.bf16.mxu1 %v3005_v5 }
 0x65f   :  { %v1250_v37 = vmax.f32 %v1200_v36, 0.0  ;;  %3008 = vmatpush3.bf16.msra.mxu1 %v3005_v5 }
 0x660   :  { %v1249_v42 = vmax.f32 %v1195_v54, 0.0  ;;  %v2674_v12 = vpop.f32.mrb[10].mxu0  ;;  %v3009_v14 = vpack.c.bf16 %v4255_v8, %v4259_v31 }
 0x661   :  { %v4265_v26 = vmul.f32 %v1250_v37, %v3321_v41  ;;  %v1210_v9 = vadd.f32 %v2674_v12, %v4230_v60  ;;  %v1204_v52 = vpop.f32.mrb[11].mxu0 }
 0x662   :  { %v4269_v53 = vmul.f32 %v1249_v42, %v3328_v43  ;;  %v1205_v63 = vadd.f32 %v1204_v52, %v4230_v60  ;;  %3010 = vmatprep.subr.bf16.mxu1 %v3009_v14 }
 0x663   :  { %v1252_v2 = vmax.f32 %v1210_v9, 0.0  ;;  %3012 = vmatpush3.bf16.msra.mxu1 %v3009_v14  ;;  %v4791_v9 = vld [vmem:[#allocation2_spill] sm:$0xff] }
 0x664   :  { %v1251_v16 = vmax.f32 %v1205_v63, 0.0  ;;  %v2677_v32 = vpop.f32.mrb[12].mxu0  ;;  %v3013_v28 = vpack.c.bf16 %v4265_v26, %v4269_v53 }
 0x665   :  { %v4275_v6 = vmul.f32 %v1252_v2, %v3349_v49  ;;  %v1220_v38 = vadd.f32 %v2677_v32, %v4230_v60  ;;  %v1214_v18 = vpop.f32.mrb[13].mxu0 }
 0x666   :  { %v4279_v17 = vmul.f32 %v1251_v16, %v3356_v51  ;;  %v1215_v47 = vadd.f32 %v1214_v18, %v4230_v60  ;;  %3014 = vmatprep.subr.bf16.mxu1 %v3013_v28  ;;  %v4792_v16 = vld [vmem:[#allocation3_spill] sm:$0xff] }
 0x667   :  { %v1254_v48 = vmax.f32 %v1220_v38, 0.0  ;;  %3016 = vmatpush3.bf16.msra.mxu1 %v3013_v28 }
 0x668   :  { %v1253_v58 = vmax.f32 %v1215_v47, 0.0  ;;  %v2680_v23 = vpop.f32.mrb[14].mxu0  ;;  %v3017_v13 = vpack.c.bf16 %v4275_v6, %v4279_v17 }
 0x669   :  { %v4285_v55 = vmul.f32 %v1254_v48, %v3377_v57  ;;  %v1230_v5 = vadd.f32 %v2680_v23, %v4230_v60  ;;  %v1224_v36 = vpop.f32.mrb[15].mxu0  ;;  %v4793_v48 = vld [vmem:[#allocation4_spill] sm:$0xff]  ;;  %v2289_v23 = vld [vmem:[%s4661_s6 + $0x40] sm:$0xff] }
 0x66a   :  { %v4289_v10 = vmul.f32 %v1253_v58, %v3384_v59  ;;  %v1225_v54 = vadd.f32 %v1224_v36, %v4230_v60  ;;  %3018 = vmatprep.subr.bf16.mxu1 %v3017_v13 }
 0x66b   :  { %v1256_v37 = vmax.f32 %v1230_v5, 0.0  ;;  %3020 = vmatpush3.bf16.msra.mxu1 %v3017_v13  ;;  %v2290_v13 = vld [vmem:[%s4661_s6 + $0x48] sm:$0xff]  ;;  %v4794_v5 = vld [vmem:[#allocation5_spill] sm:$0xff] }
 0x66c   :  { %v1255_v42 = vmax.f32 %v1225_v54, 0.0  ;;  %v2683_v12 = vpop.f32.mrb[16].mxu0  ;;  %v3021_v14 = vpack.c.bf16 %v4285_v55, %v4289_v10  ;;  %v3033_v54 = vpack.c.bf16 %v2290_v13, %v2289_v23  ;;  %v4797_v13 = vld [vmem:[#allocation12_spill] sm:$0xff] }
 0x66d   :  { %v4295_v52 = vmul.f32 %v1256_v37, %v4791_v9  ;;  %v1240_v63 = vadd.f32 %v2683_v12, %v4230_v60  ;;  %v1234_v2 = vpop.f32.mrb[17].mxu0  ;;  %v2291_v37 = vld [vmem:[%s4661_s6 + $0x50] sm:$0xff] }
 0x66e   :  { %v4299_v32 = vmul.f32 %v1255_v42, %v4792_v16  ;;  %v1235_v28 = vadd.f32 %v1234_v2, %v4230_v60  ;;  %3022 = vmatprep.subr.bf16.mxu1 %v3021_v14  ;;  %v2292_v42 = vld [vmem:[%s4661_s6 + $0x58] sm:$0xff] }
 0x66f   :  { %v1258_v38 = vmax.f32 %v1240_v63, 0.0  ;;  %3024 = vmatpush3.bf16.msra.mxu1 %v3021_v14  ;;  %v3037_v12 = vpack.c.bf16 %v2292_v42, %v2291_v37  ;;  %v2293_v14 = vld [vmem:[%s4661_s6 + $0x60] sm:$0xff]  ;;  %v2294_v63 = vld [vmem:[%s4661_s6 + $0x68] sm:$0xff]  ;;  %v4795_v2 = vld [vmem:[#allocation9_spill] sm:$0xff] }
 0x670   :  { %v1257_v18 = vmax.f32 %v1235_v28, 0.0  ;;  %v3025_v47 = vpack.c.bf16 %v4295_v52, %v4299_v32  ;;  %vm4796_vm12 = vcmp.eq.s32.totalorder %v3679_v22, %v4795_v2  ;;  %v3041_v28 = vpack.c.bf16 %v2294_v63, %v2293_v14  ;;  %v2315_v37 = vld [vmem:[%s4661_s6 + $0xc0] sm:$0xff]  ;;  %v2316_v42 = vld [vmem:[%s4661_s6 + $0xc8] sm:$0xff]  ;;  %v2318_v14 = vld [vmem:[%s4661_s6 + $0xd8] sm:$0xff] }
 0x671   :  { %v4305_v58 = vmul.f32 %v1258_v38, %v4793_v48  ;;  %v2295_v38 = vld [vmem:[%s4661_s6 + $0x70] sm:$0xff]  ;;  %v2319_v2 = vld [vmem:[%s4661_s6 + $0xe0] sm:$0xff] }
 0x672   :  { %v4314_v60 = vmul.f32 %v1257_v18, %v4794_v5  ;;  %3026 = vmatprep.subr.bf16.mxu1 %v3025_v47  ;;  %v2296_v18 = vld [vmem:[%s4661_s6 + $0x78] sm:$0xff] }
 0x673   :  { %3028 = vmatpush3.bf16.msra.mxu1 %v3025_v47  ;;  %v3045_v47 = vpack.c.bf16 %v2296_v18, %v2295_v38  ;;  %v2321_v18 = vld [vmem:[%s4661_s6 + $0xf0] sm:$0xff] }
 0x674   :  { %v3029_v36 = vpack.c.bf16 %v4305_v58, %v4314_v60 }
 0x676   :  { %3030 = vmatprep.subr.bf16.mxu1 %v3029_v36 }
 0x677   :  { %3032 = vmatpush3.bf16.msra.mxu1 %v3029_v36 }
 0x678   :  { %3034 = vmatprep.subr.bf16.mxu1 %v3033_v54 }
 0x67a   :  { %2717 = vmatmul.mubr.msk.f32.vlgmr.msra.gmra.mrb[18].mxu1 %vm4796_vm12, %v4773_v15  ;;  %vm4817_vm12 = vmmov %vm4778_vm0 }
 0x67b   :  { %3036 = vmatpush3.bf16.msra.mxu1 %v3033_v54  ;;  %v4799_v54 = vld [vmem:[#allocation11_spill] sm:$0xff] }
 0x67c   :  { %3038 = vmatprep.subr.bf16.mxu1 %v3037_v12 }
 0x67f   :  { %3040 = vmatpush3.bf16.msra.mxu1 %v3037_v12  ;;  %v3053_v12 = vpack.c.bf16 %v2316_v42, %v2315_v37 }
 0x680   :  { %3042 = vmatprep.subr.bf16.mxu1 %v3041_v28 }
 0x681   :  { %3054 = vmatprep.subr.bf16.mxu0 %v3053_v12 }
 0x682   :  { %3056 = vmatpush3.bf16.msra.mxu0 %v3053_v12 }
 0x683   :  { %3044 = vmatpush3.bf16.msra.mxu1 %v3041_v28  ;;  %v2320_v28 = vld [vmem:[%s4661_s6 + $0xe8] sm:$0xff] }
 0x684   :  { %3046 = vmatprep.subr.bf16.mxu1 %v3045_v47  ;;  %v3061_v38 = vpack.c.bf16 %v2320_v28, %v2319_v2  ;;  %v4801_v2 = vld [vmem:[#allocation7_spill] sm:$0xff] }
 0x687   :  { %3048 = vmatpush3.bf16.msra.mxu1 %v3045_v47  ;;  %v2322_v47 = vld [vmem:[%s4661_s6 + $0xf8] sm:$0xff] }
 0x74d   :  { %v2718_v23 = vpop.f32.mrb[18].mxu1 }
 0x74e   :  { %v1341_v22 = vpop.f32.mrb[19].mxu1  ;;  %v1351_v36 = vadd.f32 %v2718_v23, %v4797_v13  ;;  %v3065_v23 = vpack.c.bf16 %v2322_v47, %v2321_v18  ;;  %v4802_v18 = vld [vmem:[#allocation13_spill] sm:$0xff]  ;;  %v4803_v47 = vld [vmem:[#allocation14_spill] sm:$0xff] }
 0x74f   :  { %v1350_v15 = vadd.f32 %v1341_v22, %v3867_v62  ;;  %v2317_v62 = vld [vmem:[%s4661_s6 + $0xd0] sm:$0xff]  ;;  %v1363_v22 = vsub.s32 5, %v3488_v44 }
 0x750   :  { %v3057_v63 = vpack.c.bf16 %v2318_v14, %v2317_v62  ;;  %v4800_v14 = vld [vmem:[#allocation8_spill] sm:$0xff] }
 0x751   :  { %2735 = vmatprep.mubr.msk.f32.mxu1 %vm4798_vm2, %v1350_v15  ;;  %v4374_v15 = vld [vmem:[%s4660_s5] sm:$0xff]  ;;  %vm4818_vm2 = vmmov %vm4778_vm0 }
 0x752   :  { %2736 = vmatmul.mubr.msk.f32.vlgmr.msra.gmra.mrb[20].mxu1 %vm4778_vm0, %v1351_v36  ;;  %3058 = vmatprep.subr.bf16.mxu0 %v3057_v63  ;;  %v1364_v13 = vrot.slane %v4374_v15, %v1363_v22 }
 0x753   :  { %2742 = vmatprep.mubr.msk.f32.mxu1 %vm827_vm7, %v4799_v54  ;;  %3060 = vmatpush3.bf16.msra.mxu0 %v3057_v63 }
 0x754   :  { %3062 = vmatprep.subr.bf16.mxu0 %v3061_v38 }
 0x757   :  { %3064 = vmatpush3.bf16.msra.mxu0 %v3061_v38 }
 0x758   :  { %3066 = vmatprep.subr.bf16.mxu0 %v3065_v23 }
 0x75b   :  { %3068 = vmatpush3.bf16.msra.mxu0 %v3065_v23 }
 0x825   :  { %v2737_v36 = vpop.f32.mrb[20].mxu1 }
 0x826   :  { %v1443_v54 = vadd.f32 %v2737_v36, %v1364_v13  ;;  %v1437_v37 = vpop.f32.mrb[21].mxu1 }
 0x827   :  { %v1438_v42 = vadd.f32 %v1437_v37, %v1364_v13 }
 0x828   :  { %v1447_v62 = vmax.f32 %v1443_v54, 0.0 }
 0x829   :  { %v1446_v12 = vmax.f32 %v1438_v42, 0.0 }
 0x82a   :  { %v1449_v63 = vmul.f32 %v1447_v62, %v4800_v14  ;;  %v3142_v62 = vmov 0.0|0.0  }
 0x82b   :  { %v1448_v28 = vmul.f32 %v1446_v12, %v4801_v2  ;;  %3093 = vmatprep.subr.bf16.mxu0 %v3142_v62  ;;  %v2342_v12 = vld [vmem:[%s4661_s6 + $0x118] sm:$0xff]  ;;  %v2344_v2 = vld [vmem:[%s4661_s6 + $0x128] sm:$0xff] }
 0x82d   :  { %v3049_v38 = vpack.c.bf16 %v1449_v63, %v1448_v28  ;;  %v2343_v63 = vld [vmem:[%s4661_s6 + $0x120] sm:$0xff] }
 0x82e   :  { %v3100_v28 = vpack.c.bf16 %v2344_v2, %v2343_v63 }
 0x82f   :  { %3050 = vmatprep.subr.bf16.mxu1 %v3049_v38 }
 0x830   :  { %3052 = vmatpush3.bf16.msra.mxu1 %v3049_v38  ;;  %v2345_v38 = vld [vmem:[%s4661_s6 + $0x130] sm:$0xff] }
 0x831   :  { %3069 = vmatprep.subr.bf16.mxu1 %v3142_v62 }
 0x833   :  { %2743 = vmatmul.mubr.msk.f32.vlgmr.msra.gmra.mrb[22].mxu1 %vm827_vm7, %v4802_v18  ;;  %v2346_v18 = vld [vmem:[%s4661_s6 + $0x138] sm:$0xff] }
 0x834   :  { %2745 = vmatprep.mubr.msk.f32.mxu1 %vm827_vm7, %v4803_v47  ;;  %v3103_v47 = vpack.c.bf16 %v2346_v18, %v2345_v38 }
 0x837   :  { %2746 = vmatmul.mubr.msk.f32.gmra.mrb[24].mxu1 %vm827_vm7, %v3931_v3 }
 0x838   :  { %2748 = vmatprep.mubr.msk.f32.mxu1 %vm827_vm7, %v3933_v46 }
 0x83b   :  { %2749 = vmatmul.mubr.msk.f32.gmra.mrb[26].mxu1 %vm827_vm7, %v4000_v56 }
 0x83c   :  { %2751 = vmatprep.mubr.msk.f32.mxu1 %vm827_vm7, %v4005_v7 }
 0x83f   :  { %2752 = vmatmul.mubr.msk.f32.gmra.mrb[28].mxu1 %vm827_vm7, %v4007_v4 }
 0x840   :  { %2754 = vmatprep.mubr.msk.f32.mxu1 %vm827_vm7, %v4009_v29 }
 0x843   :  { %2755 = vmatmul.mubr.msk.f32.gmra.mrb[30].mxu1 %vm827_vm7, %v4102_v30 }
 0x844   :  { %2757 = vmatprep.mubr.msk.f32.mxu1 %vm827_vm7, %v4116_v45 }
 0x847   :  { %2758 = vmatmul.mubr.msk.f32.gmra.mrb[32].mxu1 %vm827_vm7, %v4153_v21 }
 0x848   :  { %2760 = vmatprep.mubr.msk.f32.mxu1 %vm827_vm7, %v4157_v11 }
 0x84b   :  { %2761 = vmatmul.mubr.msk.f32.gmra.mrb[34].mxu1 %vm827_vm7, %v4170_v0 }
 0x84c   :  { %2763 = vmatprep.mubr.msk.f32.mxu1 %vm827_vm7, %v4174_v50 }
 0x84f   :  { %2764 = vmatmul.mubr.msk.f32.gmra.mrb[36].mxu1 %vm827_vm7, %v4180_v61  ;;  %vm4807_vm7 = vmmov %vm4778_vm0 }
 0x906   :  { %v2744_v46 = vpop.f32.mrb[22].mxu1 }
 0x907   :  { %v1516_v29 = vpop.f32.mrb[23].mxu1  ;;  %v1596_v56 = vadd.f32 %v2744_v46, %v4235_v24  ;;  %v1622_v46 = vsub.s32 7, %v3488_v44 }
 0x908   :  { %v1595_v3 = vadd.f32 %v1516_v29, %v4239_v39 }
 0x909   :  { %v4477_v29 = vrot.slane %v4374_v15, %v1622_v46 }
 0x90a   :  { %v2747_v7 = vpop.f32.mrb[24].mxu1  ;;  %2782 = vmatprep.mubr.msk.f32.mxu0 %vm4804_vm1, %v1595_v3  ;;  %vm3143_vm1 = vmmov 0  }
 0x90b   :  { %v1526_v4 = vpop.f32.mrb[25].mxu1  ;;  %2783 = vmatmul.mubr.msk.f32.vlgmr.msra.gmra.mrb[18].mxu0 %vm4805_vm13, %v1596_v56  ;;  %v1598_v45 = vadd.f32 %v2747_v7, %v4245_v40  ;;  %2838 = vmatprep.mubr.msk.f32.mxu1 %vm3143_vm1, %v4735_v1  ;;  %vm4819_vm13 = vmmov %vm4778_vm0 }
 0x90c   :  { %v1597_v30 = vadd.f32 %v1526_v4, %v4249_v34 }
 0x90e   :  { %v2750_v21 = vpop.f32.mrb[26].mxu1  ;;  %2785 = vmatprep.mubr.msk.f32.mxu0 %vm4806_vm14, %v1597_v30  ;;  %vm4820_vm14 = vmmov %vm4778_vm0 }
 0x90f   :  { %v1536_v11 = vpop.f32.mrb[27].mxu1  ;;  %2786 = vmatmul.mubr.msk.f32.gmra.mrb[20].mxu0 %vm4807_vm7, %v1598_v45  ;;  %v1600_v50 = vadd.f32 %v2750_v21, %v4255_v8  ;;  %vm4821_vm7 = vmmov %vm4778_vm0 }
 0x910   :  { %v1599_v0 = vadd.f32 %v1536_v11, %v4259_v31 }
 0x912   :  { %v2753_v61 = vpop.f32.mrb[28].mxu1  ;;  %2788 = vmatprep.mubr.msk.f32.mxu0 %vm4808_vm15, %v1599_v0  ;;  %vm4822_vm15 = vmmov %vm4778_vm0 }
 0x913   :  { %v1546_v24 = vpop.f32.mrb[29].mxu1  ;;  %2789 = vmatmul.mubr.msk.f32.gmra.mrb[22].mxu0 %vm4809_vm3, %v1600_v50  ;;  %v1602_v40 = vadd.f32 %v2753_v61, %v4265_v26  ;;  %vm4823_vm3 = vmmov %vm4778_vm0 }
 0x914   :  { %v1601_v39 = vadd.f32 %v1546_v24, %v4269_v53 }
 0x916   :  { %v2756_v34 = vpop.f32.mrb[30].mxu1  ;;  %2791 = vmatprep.mubr.msk.f32.mxu0 %vm4810_vm4, %v1601_v39  ;;  %vm4824_vm4 = vmmov %vm4778_vm0 }
 0x917   :  { %v1556_v23 = vpop.f32.mrb[31].mxu1  ;;  %2792 = vmatmul.mubr.msk.f32.gmra.mrb[24].mxu0 %vm4811_vm6, %v1602_v40  ;;  %v1604_v8 = vadd.f32 %v2756_v34, %v4275_v6  ;;  %vm4825_vm6 = vmmov %vm4778_vm0 }
 0x918   :  { %v1603_v31 = vadd.f32 %v1556_v23, %v4279_v17 }
 0x91a   :  { %v2759_v22 = vpop.f32.mrb[32].mxu1  ;;  %2794 = vmatprep.mubr.msk.f32.mxu0 %vm4812_vm8, %v1603_v31  ;;  %vm4827_vm8 = vmmov %vm4778_vm0 }
 0x91b   :  { %v1566_v13 = vpop.f32.mrb[33].mxu1  ;;  %2795 = vmatmul.mubr.msk.f32.gmra.mrb[26].mxu0 %vm4813_vm9, %v1604_v8  ;;  %v1606_v26 = vadd.f32 %v2759_v22, %v4285_v55  ;;  %vm4828_vm9 = vmmov %vm4778_vm0 }
 0x91c   :  { %v1605_v53 = vadd.f32 %v1566_v13, %v4289_v10 }
 0x91e   :  { %v2762_v36 = vpop.f32.mrb[34].mxu1  ;;  %2797 = vmatprep.mubr.msk.f32.mxu0 %vm4814_vm10, %v1605_v53  ;;  %vm4829_vm10 = vmmov %vm4778_vm0 }
 0x91f   :  { %v1576_v54 = vpop.f32.mrb[35].mxu1  ;;  %2798 = vmatmul.mubr.msk.f32.gmra.mrb[28].mxu0 %vm4815_vm11, %v1606_v26  ;;  %v1608_v6 = vadd.f32 %v2762_v36, %v4295_v52  ;;  %v2339_v52 = vld [vmem:[%s4661_s6 + $0x100] sm:$0xff]  ;;  %vm4830_vm11 = vmmov %vm4778_vm0 }
 0x920   :  { %v1607_v17 = vadd.f32 %v1576_v54, %v4299_v32  ;;  %v2340_v32 = vld [vmem:[%s4661_s6 + $0x108] sm:$0xff] }
 0x922   :  { %v2765_v37 = vpop.f32.mrb[36].mxu1  ;;  %2800 = vmatprep.mubr.msk.f32.mxu0 %vm4816_vm5, %v1607_v17  ;;  %vm4831_vm5 = vmmov %vm4778_vm0 }
 0x923   :  { %v1586_v42 = vpop.f32.mrb[37].mxu1  ;;  %2801 = vmatmul.mubr.msk.f32.gmra.mrb[30].mxu0 %vm4817_vm12, %v1608_v6  ;;  %v1610_v55 = vadd.f32 %v2765_v37, %v4305_v58  ;;  %v2341_v58 = vld [vmem:[%s4661_s6 + $0x110] sm:$0xff]  ;;  %vm4832_vm12 = vmmov %vm4778_vm0 }
 0x924   :  { %v1609_v10 = vadd.f32 %v1586_v42, %v4314_v60  ;;  %v3094_v60 = vpack.c.bf16 %v2340_v32, %v2339_v52  ;;  %v3097_v14 = vpack.c.bf16 %v2342_v12, %v2341_v58 }
 0x926   :  { %2803 = vmatprep.mubr.msk.f32.mxu0 %vm4818_vm2, %v1609_v10  ;;  %3095 = vmatpush3.bf16.msra.mxu0 %v3094_v60  ;;  %vm4833_vm2 = vmmov %vm4778_vm0 }
 0x927   :  { %2804 = vmatmul.mubr.msk.f32.gmra.mrb[32].mxu0 %vm4778_vm0, %v1610_v55  ;;  %3096 = vmatprep.subr.bf16.mxu0 %v3142_v62  ;;  %vm2231_vm0 = vcmask 31744  }
 0x928   :  { %2875 = vmatprep.mubr.msk.f32.mxu0 %vm3143_vm1, %v4735_v1 }
 0x92a   :  { %3098 = vmatpush3.bf16.msra.mxu0 %v3097_v14 }
 0x92b   :  { %3099 = vmatprep.subr.bf16.mxu0 %v3142_v62 }
 0x92e   :  { %3101 = vmatpush3.bf16.msra.mxu0 %v3100_v28 }
 0x92f   :  { %3102 = vmatprep.subr.bf16.mxu0 %v3142_v62 }
 0x932   :  { %3104 = vmatpush3.bf16.msra.mxu0 %v3103_v47 }
 0x933   :  { %3105 = vmatprep.subr.bf16.mxu0 %v3142_v62 }
 0x9de   :  { %v2784_v3 = vpop.f32.mrb[18].mxu0 }
 0x9df   :  { %v1744_v56 = vadd.f32 %v2784_v3, %v4477_v29  ;;  %v1738_v7 = vpop.f32.mrb[19].mxu0 }
 0x9e0   :  { %v1739_v4 = vadd.f32 %v1738_v7, %v4477_v29 }
 0x9e1   :  { %v1818_v30 = vmax.f32 %v1744_v56, 0.0 }
 0x9e2   :  { %v1817_v45 = vmax.f32 %v1739_v4, 0.0  ;;  %v2787_v21 = vpop.f32.mrb[20].mxu0 }
 0x9e3   :  { %v1834_v11 = vmul.f32 %v1818_v30, %v3273_v27  ;;  %v1754_v0 = vadd.f32 %v2787_v21, %v4477_v29  ;;  %v1748_v50 = vpop.f32.mrb[21].mxu0 }
 0x9e4   :  { %v1833_v61 = vmul.f32 %v1817_v45, %v3249_v20  ;;  %v1749_v44 = vadd.f32 %v1748_v50, %v4477_v29 }
 0x9e5   :  { %v1820_v15 = vmax.f32 %v1754_v0, 0.0 }
 0x9e6   :  { %v3070_v24 = vpack.c.bf16 %v1834_v11, %v1833_v61  ;;  %v1819_v39 = vmax.f32 %v1749_v44, 0.0  ;;  %v2790_v40 = vpop.f32.mrb[22].mxu0 }
 0x9e7   :  { %v1836_v34 = vmul.f32 %v1820_v15, %v3266_v25  ;;  %v1764_v23 = vadd.f32 %v2790_v40, %v4477_v29  ;;  %v1758_v31 = vpop.f32.mrb[23].mxu0  ;;  %v1854_v40 = vld [vmem:[%s4662_s7 + $0x28] sm:$0xff] }
 0x9e8   :  { %v1835_v8 = vmul.f32 %v1819_v39, %v3247_v19  ;;  %v1759_v27 = vadd.f32 %v1758_v31, %v4477_v29  ;;  %3071 = vmatpush3.bf16.msra.mxu1 %v3070_v24  ;;  %v1853_v39 = vld [vmem:[%s4662_s7 + $0x20] sm:$0xff]  ;;  %v2355_v31 = vld [vmem:[%s4661_s6 + $0x148] sm:$0xff] }
 0x9e9   :  { %v1822_v22 = vmax.f32 %v1764_v23, 0.0  ;;  %3072 = vmatprep.subr.bf16.mxu1 %v3142_v62  ;;  %v2354_v23 = vld [vmem:[%s4661_s6 + $0x140] sm:$0xff] }
 0x9ea   :  { %v3073_v20 = vpack.c.bf16 %v1836_v34, %v1835_v8  ;;  %v1821_v13 = vmax.f32 %v1759_v27, 0.0  ;;  %v2793_v53 = vpop.f32.mrb[24].mxu0  ;;  %v1855_v34 = vld [vmem:[%s4662_s7 + $0x30] sm:$0xff]  ;;  %v3106_v8 = vpack.c.bf16 %v2355_v31, %v2354_v23 }
 0x9eb   :  { %v1838_v26 = vmul.f32 %v1822_v22, %v3293_v33  ;;  %v1774_v36 = vadd.f32 %v2793_v53, %v4477_v29  ;;  %v1768_v54 = vpop.f32.mrb[25].mxu0  ;;  %v2356_v27 = vld [vmem:[%s4661_s6 + $0x150] sm:$0xff]  ;;  %v2357_v22 = vld [vmem:[%s4661_s6 + $0x158] sm:$0xff]  ;;  %v2359_v53 = vld [vmem:[%s4661_s6 + $0x168] sm:$0xff] }
 0x9ec   :  { %v1837_v25 = vmul.f32 %v1821_v13, %v3300_v35  ;;  %v1769_v17 = vadd.f32 %v1768_v54, %v4477_v29  ;;  %3074 = vmatpush3.bf16.msra.mxu1 %v3073_v20  ;;  %v3109_v20 = vpack.c.bf16 %v2357_v22, %v2356_v27  ;;  %v2358_v13 = vld [vmem:[%s4661_s6 + $0x160] sm:$0xff] }
 0x9ed   :  { %v1824_v19 = vmax.f32 %v1774_v36, 0.0  ;;  %3075 = vmatprep.subr.bf16.mxu1 %v3142_v62 }
 0x9ee   :  { %v3076_v6 = vpack.c.bf16 %v1838_v26, %v1837_v25  ;;  %v1823_v37 = vmax.f32 %v1769_v17, 0.0  ;;  %v2796_v42 = vpop.f32.mrb[26].mxu0  ;;  %v3112_v26 = vpack.c.bf16 %v2359_v53, %v2358_v13 }
 0x9ef   :  { %v1840_v10 = vmul.f32 %v1824_v19, %v3321_v41  ;;  %v1784_v55 = vadd.f32 %v2796_v42, %v4477_v29  ;;  %v1778_v52 = vpop.f32.mrb[27].mxu0 }
 0x9f0   :  { %v1839_v33 = vmul.f32 %v1823_v37, %v3328_v43  ;;  %v1779_v32 = vadd.f32 %v1778_v52, %v4477_v29  ;;  %3077 = vmatpush3.bf16.msra.mxu1 %v3076_v6 }
 0x9f1   :  { %v1826_v35 = vmax.f32 %v1784_v55, 0.0  ;;  %3078 = vmatprep.subr.bf16.mxu1 %v3142_v62 }
 0x9f2   :  { %v3079_v58 = vpack.c.bf16 %v1840_v10, %v1839_v33  ;;  %v1825_v60 = vmax.f32 %v1779_v32, 0.0  ;;  %v2799_v12 = vpop.f32.mrb[28].mxu0 }
 0x9f3   :  { %v1842_v14 = vmul.f32 %v1826_v35, %v3349_v49  ;;  %v1794_v63 = vadd.f32 %v2799_v12, %v4477_v29  ;;  %v1788_v2 = vpop.f32.mrb[29].mxu0  ;;  %v2360_v35 = vld [vmem:[%s4661_s6 + $0x170] sm:$0xff]  ;;  %v49_v12 = vld [vmem:[%s4660_s5 + $0x8] sm:$0x3] }
 0x9f4   :  { %v1841_v41 = vmul.f32 %v1825_v60, %v3356_v51  ;;  %v1789_v28 = vadd.f32 %v1788_v2, %v4477_v29  ;;  %3080 = vmatpush3.bf16.msra.mxu1 %v3079_v58  ;;  %v2361_v58 = vld [vmem:[%s4661_s6 + $0x178] sm:$0xff] }
 0x9f5   :  { %v1828_v43 = vmax.f32 %v1794_v63, 0.0  ;;  %3081 = vmatprep.subr.bf16.mxu1 %v3142_v62  ;;  %v3115_v60 = vpack.c.bf16 %v2361_v58, %v2360_v35 }
 0x9f6   :  { %v3082_v38 = vpack.c.bf16 %v1842_v14, %v1841_v41  ;;  %v1827_v18 = vmax.f32 %v1789_v28, 0.0  ;;  %v2802_v47 = vpop.f32.mrb[30].mxu0  ;;  %v4826_v14 = vld [vmem:[#allocation10_spill] sm:$0xff] }
 0x9f7   :  { %v1844_v46 = vmul.f32 %v1828_v43, %v3377_v57  ;;  %v1804_v3 = vadd.f32 %v2802_v47, %v4477_v29  ;;  %v1798_v56 = vpop.f32.mrb[31].mxu0  ;;  %v1968_v63 = vrot.slane %v49_v12, %v4826_v14 }
 0x9f8   :  { %v1843_v49 = vmul.f32 %v1827_v18, %v3384_v59  ;;  %v1799_v7 = vadd.f32 %v1798_v56, %v4477_v29  ;;  %3083 = vmatpush3.bf16.msra.mxu1 %v3082_v38 }
 0x9f9   :  { %v1830_v51 = vmax.f32 %v1804_v3, 0.0  ;;  %3084 = vmatprep.subr.bf16.mxu1 %v3142_v62 }
 0x9fa   :  { %v3085_v4 = vpack.c.bf16 %v1844_v46, %v1843_v49  ;;  %v1829_v30 = vmax.f32 %v1799_v7, 0.0  ;;  %v2805_v45 = vpop.f32.mrb[32].mxu0 }
 0x9fb   :  { %v1846_v21 = vmul.f32 %v1830_v51, %v4791_v9  ;;  %v1814_v11 = vadd.f32 %v2805_v45, %v4477_v29  ;;  %v1808_v0 = vpop.f32.mrb[33].mxu0 }
 0x9fc   :  { %v1845_v57 = vmul.f32 %v1829_v30, %v4792_v16  ;;  %v1809_v50 = vadd.f32 %v1808_v0, %v4477_v29  ;;  %3086 = vmatpush3.bf16.msra.mxu1 %v3085_v4  ;;  %v1849_v16 = vld [vmem:[%s4662_s7] sm:$0xff]  ;;  %v1852_v29 = vld [vmem:[%s4662_s7 + $0x18] sm:$0xff] }
 0x9fd   :  { %v1832_v59 = vmax.f32 %v1814_v11, 0.0  ;;  %3087 = vmatprep.subr.bf16.mxu1 %v3142_v62 }
 0x9fe   :  { %v3088_v61 = vpack.c.bf16 %v1846_v21, %v1845_v57  ;;  %v1831_v44 = vmax.f32 %v1809_v50, 0.0 }
 0x9ff   :  { %v1848_v15 = vmul.f32 %v1832_v59, %v4793_v48  ;;  %v1850_v48 = vld [vmem:[%s4662_s7 + $0x8] sm:$0xff] }
 0xa00   :  { %v1847_v24 = vmul.f32 %v1831_v44, %v4794_v5  ;;  %3089 = vmatpush3.bf16.msra.mxu1 %v3088_v61  ;;  %v1851_v5 = vld [vmem:[%s4662_s7 + $0x10] sm:$0xff] }
 0xa01   :  { %3090 = vmatprep.subr.bf16.mxu1 %v3142_v62 }
 0xa02   :  { %v3091_v9 = vpack.c.bf16 %v1848_v15, %v1847_v24 }
 0xa04   :  { %3092 = vmatpush3.bf16.msra.mxu1 %v3091_v9 }
 0xa05   :  { %3117 = vmatprep.subr.bf16.mxu1 %v3142_v62 }
 0xa07   :  { %2839 = vmatmul.mubr.f32.vlgmr.msra.gmra.mrb[38].mxu1 %v1849_v16 }
 0xa08   :  { %2841 = vmatprep.mubr.msk.f32.mxu1 %vm3143_vm1, %v4735_v1  ;;  %3121 = vmatpush3.bf16.msra.mxu1 %v3106_v8 }
 0xa09   :  { %3118 = vmatprep.subr.bf16.mxu1 %v3142_v62 }
 0xa0b   :  { %2842 = vmatmul.mubr.f32.gmra.mrb[40].mxu1 %v1850_v48  ;;  %v4834_v48 = vld [vmem:[#allocation6_spill] sm:$0xff] }
 0xa0c   :  { %2844 = vmatprep.mubr.msk.f32.mxu1 %vm3143_vm1, %v4735_v1  ;;  %3122 = vmatpush3.bf16.msra.mxu1 %v3109_v20 }
 0xa0d   :  { %3119 = vmatprep.subr.bf16.mxu1 %v3142_v62 }
 0xa0f   :  { %2845 = vmatmul.mubr.f32.gmra.mrb[42].mxu1 %v1851_v5  ;;  %v2109_v5 = vrot.slane %v49_v12, %v4834_v48 }
 0xa10   :  { %2847 = vmatprep.mubr.msk.f32.mxu1 %vm3143_vm1, %v4735_v1  ;;  %3123 = vmatpush3.bf16.msra.mxu1 %v3112_v26 }
 0xa11   :  { %3120 = vmatprep.subr.bf16.mxu1 %v3142_v62 }
 0xa13   :  { %2848 = vmatmul.mubr.f32.gmra.mrb[44].mxu1 %v1852_v29 }
 0xa14   :  { %2850 = vmatprep.mubr.msk.f32.mxu1 %vm3143_vm1, %v4735_v1  ;;  %3124 = vmatpush3.bf16.msra.mxu1 %v3115_v60 }
 0xa17   :  { %2851 = vmatmul.mubr.f32.gmra.mrb[46].mxu1 %v1853_v39 }
 0xa18   :  { %2853 = vmatprep.mubr.msk.f32.mxu1 %vm3143_vm1, %v4735_v1 }
 0xa1b   :  { %2854 = vmatmul.mubr.f32.gmra.mrb[48].mxu1 %v1854_v40 }
 0xa1c   :  { %2856 = vmatprep.mubr.msk.f32.mxu1 %vm3143_vm1, %v4735_v1 }
 0xa1f   :  { %2857 = vmatmul.mubr.f32.gmra.mrb[50].mxu1 %v1855_v34 }
 0xa20   :  { %2918 = vmatprep.mubr.msk.f32.mxu1 %vm3143_vm1, %v4735_v1 }
 0xada   :  { %v1922_v36 = vpop.f32.mrb[38].mxu1 }
 0xadb   :  { %v2840_v54 = vpop.f32.mrb[39].mxu1  ;;  %2876 = vmatmul.mubr.msk.f32.vlgmr.msra.gmra.mrb[34].mxu0 %vm4819_vm13, %v1922_v36 }
 0xadc   :  { %2878 = vmatprep.mubr.msk.f32.mxu0 %vm3143_vm1, %v4735_v1  ;;  %3107 = vmatpush3.bf16.msra.mxu0 %v3106_v8 }
 0xadd   :  { %3108 = vmatprep.subr.bf16.mxu0 %v3142_v62 }
 0xade   :  { %v1927_v25 = vpop.f32.mrb[40].mxu1 }
 0xadf   :  { %v2843_v17 = vpop.f32.mrb[41].mxu1  ;;  %2879 = vmatmul.mubr.msk.f32.gmra.mrb[36].mxu0 %vm4820_vm14, %v1927_v25 }
 0xae0   :  { %2881 = vmatprep.mubr.msk.f32.mxu0 %vm3143_vm1, %v4735_v1  ;;  %3110 = vmatpush3.bf16.msra.mxu0 %v3109_v20 }
 0xae1   :  { %3111 = vmatprep.subr.bf16.mxu0 %v3142_v62 }
 0xae2   :  { %v1932_v19 = vpop.f32.mrb[42].mxu1 }
 0xae3   :  { %v2846_v6 = vpop.f32.mrb[43].mxu1  ;;  %2882 = vmatmul.mubr.msk.f32.gmra.mrb[38].mxu0 %vm4821_vm7, %v1932_v19 }
 0xae4   :  { %2884 = vmatprep.mubr.msk.f32.mxu0 %vm3143_vm1, %v4735_v1  ;;  %3113 = vmatpush3.bf16.msra.mxu0 %v3112_v26 }
 0xae5   :  { %3114 = vmatprep.subr.bf16.mxu0 %v3142_v62 }
 0xae6   :  { %v1937_v37 = vpop.f32.mrb[44].mxu1 }
 0xae7   :  { %v2849_v42 = vpop.f32.mrb[45].mxu1  ;;  %2885 = vmatmul.mubr.msk.f32.gmra.mrb[40].mxu0 %vm4822_vm15, %v1937_v37 }
 0xae8   :  { %2887 = vmatprep.mubr.msk.f32.mxu0 %vm3143_vm1, %v4735_v1  ;;  %3116 = vmatpush3.bf16.msra.mxu0 %v3115_v60 }
 0xaea   :  { %v1942_v10 = vpop.f32.mrb[46].mxu1 }
 0xaeb   :  { %v2852_v55 = vpop.f32.mrb[47].mxu1  ;;  %2888 = vmatmul.mubr.msk.f32.gmra.mrb[42].mxu0 %vm4823_vm3, %v1942_v10 }
 0xaec   :  { %2890 = vmatprep.mubr.msk.f32.mxu0 %vm3143_vm1, %v4735_v1 }
 0xaee   :  { %v1947_v52 = vpop.f32.mrb[48].mxu1 }
 0xaef   :  { %v2855_v33 = vpop.f32.mrb[49].mxu1  ;;  %2891 = vmatmul.mubr.msk.f32.gmra.mrb[44].mxu0 %vm4824_vm4, %v1947_v52 }
 0xaf0   :  { %2893 = vmatprep.mubr.msk.f32.mxu0 %vm3143_vm1, %v4735_v1 }
 0xaf2   :  { %v1952_v62 = vpop.f32.mrb[50].mxu1 }
 0xaf3   :  { %v2858_v32 = vpop.f32.mrb[51].mxu1  ;;  %2894 = vmatmul.mubr.msk.f32.gmra.mrb[46].mxu0 %vm4825_vm6, %v1952_v62 }
 0xaf4   :  { %2912 = vmatprep.mubr.msk.f32.mxu0 %vm3143_vm1, %v4735_v1 }
 0xbae   :  { %v2056_v2 = vpop.f32.mrb[34].mxu0 }
 0xbaf   :  { %v2057_v41 = vadd.f32 %v2056_v2, %v1968_v63  ;;  %v2877_v28 = vpop.f32.mrb[35].mxu0 }
 0xbb1   :  { %v2090_v43 = vmax.f32 %v2057_v41, 0.0 }
 0xbb2   :  { %v2061_v38 = vpop.f32.mrb[36].mxu0 }
 0xbb3   :  { %v2062_v18 = vadd.f32 %v2061_v38, %v1968_v63  ;;  %v2880_v47 = vpop.f32.mrb[37].mxu0  ;;  %2913 = vmatmul.mubr.msk.f32.vlgmr.msra.gmra.mrb[48].mxu0 %vm4827_vm8, %v2090_v43 }
 0xbb4   :  { %2915 = vmatprep.mubr.msk.f32.mxu0 %vm3143_vm1, %v4735_v1 }
 0xbb5   :  { %v2091_v46 = vmax.f32 %v2062_v18, 0.0 }
 0xbb6   :  { %v2066_v3 = vpop.f32.mrb[38].mxu0 }
 0xbb7   :  { %v2067_v56 = vadd.f32 %v2066_v3, %v1968_v63  ;;  %v2883_v49 = vpop.f32.mrb[39].mxu0  ;;  %2916 = vmatmul.mubr.msk.f32.gmra.mrb[50].mxu0 %vm4828_vm9, %v2091_v46 }
 0xbb9   :  { %v2092_v7 = vmax.f32 %v2067_v56, 0.0 }
 0xbba   :  { %v2071_v51 = vpop.f32.mrb[40].mxu0 }
 0xbbb   :  { %v2072_v4 = vadd.f32 %v2071_v51, %v1968_v63  ;;  %v2886_v30 = vpop.f32.mrb[41].mxu0  ;;  %2919 = vmatmul.mubr.msk.f32.vlgmr.msra.gmra.mrb[52].mxu1 %vm4829_vm10, %v2092_v7 }
 0xbbc   :  { %2921 = vmatprep.mubr.msk.f32.mxu1 %vm3143_vm1, %v4735_v1 }
 0xbbd   :  { %v2093_v45 = vmax.f32 %v2072_v4, 0.0 }
 0xbbe   :  { %v2076_v21 = vpop.f32.mrb[42].mxu0 }
 0xbbf   :  { %v2077_v11 = vadd.f32 %v2076_v21, %v1968_v63  ;;  %v2889_v0 = vpop.f32.mrb[43].mxu0  ;;  %2922 = vmatmul.mubr.msk.f32.gmra.mrb[54].mxu1 %vm4830_vm11, %v2093_v45 }
 0xbc0   :  { %2924 = vmatprep.mubr.msk.f32.mxu1 %vm3143_vm1, %v4735_v1 }
 0xbc1   :  { %v2094_v57 = vmax.f32 %v2077_v11, 0.0 }
 0xbc2   :  { %v2081_v50 = vpop.f32.mrb[44].mxu0 }
 0xbc3   :  { %v2082_v59 = vadd.f32 %v2081_v50, %v1968_v63  ;;  %v2892_v61 = vpop.f32.mrb[45].mxu0  ;;  %2925 = vmatmul.mubr.msk.f32.gmra.mrb[56].mxu1 %vm4831_vm5, %v2094_v57 }
 0xbc4   :  { %2927 = vmatprep.mubr.msk.f32.mxu1 %vm3143_vm1, %v4735_v1 }
 0xbc5   :  { %v2095_v44 = vmax.f32 %v2082_v59, 0.0 }
 0xbc6   :  { %v2086_v15 = vpop.f32.mrb[46].mxu0 }
 0xbc7   :  { %v2087_v24 = vadd.f32 %v2086_v15, %v1968_v63  ;;  %v2895_v9 = vpop.f32.mrb[47].mxu0  ;;  %2928 = vmatmul.mubr.msk.f32.gmra.mrb[58].mxu1 %vm4832_vm12, %v2095_v44 }
 0xbc8   :  { %2930 = vmatprep.mubr.msk.f32.mxu1 %vm3143_vm1, %v4735_v1 }
 0xbc9   :  { %v2096_v16 = vmax.f32 %v2087_v24, 0.0 }
 0xbcb   :  { %2931 = vmatmul.mubr.msk.f32.gmra.mrb[60].mxu1 %vm4833_vm2, %v2096_v16 }
 0xc86   :  { %v2197_v29 = vpop.f32.mrb[48].mxu0 }
 0xc87   :  { %v2198_v39 = vadd.f32 %v2197_v29, %v2109_v5  ;;  %v2914_v40 = vpop.f32.mrb[49].mxu0 }
 0xc89   :  { %2232 = vst.msk [vmem:[%s4663_s8] sm:$0xff] %vm2231_vm0, %v2198_v39 }
 0xc8a   :  { %v2202_v34 = vpop.f32.mrb[50].mxu0 }
 0xc8b   :  { %v2203_v23 = vadd.f32 %v2202_v34, %v2109_v5  ;;  %v2917_v31 = vpop.f32.mrb[51].mxu0 }
 0xc8d   :  { %2233 = vst.msk [vmem:[%s4663_s8 + $0x8] sm:$0xff] %vm2231_vm0, %v2203_v23 }
 0xc8e   :  { %v2207_v1 = vpop.f32.mrb[52].mxu1 }
 0xc8f   :  { %v2208_v8 = vadd.f32 %v2207_v1, %v2109_v5  ;;  %v2920_v27 = vpop.f32.mrb[53].mxu1 }
 0xc91   :  { %2234 = vst.msk [vmem:[%s4663_s8 + $0x10] sm:$0xff] %vm2231_vm0, %v2208_v8 }
 0xc92   :  { %v2212_v22 = vpop.f32.mrb[54].mxu1 }
 0xc93   :  { %v2213_v20 = vadd.f32 %v2212_v22, %v2109_v5  ;;  %v2923_v13 = vpop.f32.mrb[55].mxu1 }
 0xc95   :  { %2235 = vst.msk [vmem:[%s4663_s8 + $0x18] sm:$0xff] %vm2231_vm0, %v2213_v20 }
 0xc96   :  { %v2217_v53 = vpop.f32.mrb[56].mxu1 }
 0xc97   :  { %v2218_v26 = vadd.f32 %v2217_v53, %v2109_v5  ;;  %v2926_v36 = vpop.f32.mrb[57].mxu1 }
 0xc99   :  { %2236 = vst.msk [vmem:[%s4663_s8 + $0x20] sm:$0xff] %vm2231_vm0, %v2218_v26 }
 0xc9a   :  { %v2222_v54 = vpop.f32.mrb[58].mxu1 }
 0xc9b   :  { %v2223_v25 = vadd.f32 %v2222_v54, %v2109_v5  ;;  %v2929_v17 = vpop.f32.mrb[59].mxu1 }
 0xc9d   :  { %2237 = vst.msk [vmem:[%s4663_s8 + $0x28] sm:$0xff] %vm2231_vm0, %v2223_v25 }
 0xc9e   :  { %v2227_v19 = vpop.f32.mrb[60].mxu1 }
 0xc9f   :  { %v2228_v6 = vadd.f32 %v2227_v19, %v2109_v5  ;;  %v2932_v37 = vpop.f32.mrb[61].mxu1 }
 0xca1   :  { %2238 = vst.msk [vmem:[%s4663_s8 + $0x30] sm:$0xff] %vm2231_vm0, %v2228_v6 }

</bundles_post_ra>
